<compile_context>
chip_gen: v5e
topology: v5e:2x2
jax: 0.10.0
libtpu: 0.0.40
codegen_flags: <defaults>
</compile_context>

<pallas_src>
import math
import functools

import jax
import jax.numpy as jnp
from jax.experimental import pallas as pl
from jax.experimental.pallas import tpu as pltpu


# --------------------------------------------------------------------------
# Kernel: one full decoder layer for a single batch element (grid over B)
# --------------------------------------------------------------------------
def decoder_layer_kernel(x_ref, mem_ref, tgt_bias_ref, src_bias_ref,
                         ln_ref, bqkv_ref, outb_ref,
                         wqkv_ref, wo_ref, w1_ref, b1_ref, w2_ref,
                         out_ref, *, num_heads):
    x = x_ref[0].astype(jnp.float32)            # (T, D)
    mem = mem_ref[0].astype(jnp.float32)        # (S, D)
    D = x.shape[-1]
    H = num_heads
    dk = D // H

    ln = ln_ref[...]                            # (6, D) f32: g1,b1,g2,b2,g3,b3

    def layer_norm(v, row):
        # one-pass statistics: E[x] and E[x^2] are independent reductions
        mu = jnp.mean(v, axis=-1, keepdims=True)
        ex2 = jnp.mean(v * v, axis=-1, keepdims=True)
        var = jnp.maximum(ex2 - mu * mu, 0.0)
        return (v - mu) * jax.lax.rsqrt(var + 1e-12) * ln[2 * row] + ln[2 * row + 1]

    def softmax_rows(s):
        m = jnp.max(s, axis=-1, keepdims=True)
        e = jnp.exp(s - m)
        return e * pl.reciprocal(jnp.sum(e, axis=-1, keepdims=True), approx=True)

    def split_heads(t):                         # (N, D) -> (H, N, dk)   (cheap lane slices)
        return jnp.stack([t[:, h * dk:(h + 1) * dk] for h in range(H)], axis=0)

    def merge_heads(t):                         # (H, N, dk) -> (N, D)   (lane concat)
        return jnp.concatenate([t[h] for h in range(H)], axis=-1)

    def mha(q_in, kv_in, wqkv, bqkv, wo, bo, bias, fused_qkv):
        # wqkv: (D, 3D) bf16 (1/sqrt(dk) folded into the Q block); bqkv: (3D,) f32.
        qb = q_in.astype(jnp.bfloat16)
        if fused_qkv:
            # self-attention: one (T,D)@(D,3D) matmul for Q/K/V
            qkv = jnp.dot(qb, wqkv, preferred_element_type=jnp.float32) + bqkv
            q, k, v = qkv[:, :D], qkv[:, D:2 * D], qkv[:, 2 * D:]
        else:
            # cross-attention: Q from decoder, K/V from memory
            kvb = kv_in.astype(jnp.bfloat16)
            q = jnp.dot(qb, wqkv[:, :D], preferred_element_type=jnp.float32) + bqkv[:D]
            kv = jnp.dot(kvb, wqkv[:, D:], preferred_element_type=jnp.float32) + bqkv[D:]
            k, v = kv[:, :D], kv[:, D:]

        qh = split_heads(q.astype(jnp.bfloat16))          # (H, Tq, dk)
        kh = split_heads(k.astype(jnp.bfloat16))          # (H, Tk, dk)
        vh = split_heads(v.astype(jnp.bfloat16))          # (H, Tk, dk)

        s = jnp.einsum("htf,hsf->hts", qh, kh,
                       preferred_element_type=jnp.float32)            # (H, Tq, Tk)
        p = softmax_rows(s + bias[None])                               # additive mask
        o = jnp.einsum("hts,hsf->htf", p.astype(jnp.bfloat16), vh,
                       preferred_element_type=jnp.float32)            # (H, Tq, dk)
        o = merge_heads(o).astype(jnp.bfloat16)                        # (Tq, D)
        # fused output projection over the concatenated heads (K = D)
        return jnp.dot(o, wo, preferred_element_type=jnp.float32) + bo

    # --- sublayer 1: masked multi-head self-attention ---
    h1 = layer_norm(x, 0)
    h1 = h1 + mha(h1, h1, wqkv_ref[0], bqkv_ref[0], wo_ref[0], outb_ref[0],
                  tgt_bias_ref[...], fused_qkv=True)

    # --- sublayer 2: encoder/decoder (source) attention ---
    h2 = layer_norm(h1, 1)
    h2 = h2 + mha(h2, mem, wqkv_ref[1], bqkv_ref[1], wo_ref[1], outb_ref[1],
                  src_bias_ref[...], fused_qkv=False)

    # --- sublayer 3: position-wise FFN ---
    h3 = layer_norm(h2, 2)
    ff = jnp.maximum(
        jnp.dot(h3.astype(jnp.bfloat16), w1_ref[...],
                preferred_element_type=jnp.float32) + b1_ref[0], 0.0)
    ff = jnp.dot(ff.astype(jnp.bfloat16), w2_ref[...],
                 preferred_element_type=jnp.float32) + outb_ref[2]

    out_ref[0] = (h3 + ff).astype(out_ref.dtype)


# --------------------------------------------------------------------------
# One-time parameter re-layout: fused/packed bf16 operands for the kernel
# --------------------------------------------------------------------------
def _fuse_attn(p, scale):
    """PyTorch (out,in) Linear weights -> fused (D,3D)/(D,D) bf16, scale folded into Q."""
    wqkv = jnp.concatenate([p["wq"].T * scale, p["wk"].T, p["wv"].T], axis=1)   # (D, 3D)
    bqkv = jnp.concatenate([p["bq"] * scale, p["bk"], p["bv"]])                 # (3D,)
    return (wqkv.astype(jnp.bfloat16), bqkv.astype(jnp.float32),
            p["wo"].T.astype(jnp.bfloat16), p["bo"].astype(jnp.float32))


def prepare_decoder_params(params, num_heads):
    D = params["w2"].shape[0]
    dk = D // num_heads
    scale = 1.0 / math.sqrt(dk)

    sa_wqkv, sa_bqkv, sa_wo, sa_bo = _fuse_attn(params["self_attn"], scale)
    ca_wqkv, ca_bqkv, ca_wo, ca_bo = _fuse_attn(params["src_attn"], scale)

    return {
        "ln_gb": jnp.stack([params["ln1_g"], params["ln1_b"],
                            params["ln2_g"], params["ln2_b"],
                            params["ln3_g"], params["ln3_b"]]).astype(jnp.float32),  # (6, D)
        "bqkv": jnp.stack([sa_bqkv, ca_bqkv]),                                       # (2, 3D)
        "outb": jnp.stack([sa_bo, ca_bo, params["b2"]]).astype(jnp.float32),         # (3, D)
        "wqkv": jnp.stack([sa_wqkv, ca_wqkv]),                                       # (2, D, 3D)
        "wo": jnp.stack([sa_wo, ca_wo]),                                             # (2, D, D)
        "w1": params["w1"].T.astype(jnp.bfloat16),                                   # (D, d_ff)
        "b1": params["b1"].reshape(1, -1).astype(jnp.float32),                       # (1, d_ff)
        "w2": params["w2"].T.astype(jnp.bfloat16),                                   # (d_ff, D)
    }


def _const_spec(shape):
    # full-array block, independent of the batch grid index
    return pl.BlockSpec(shape, lambda b: (0,) * len(shape))


@functools.partial(jax.jit, static_argnames=("num_heads",))
def transformer_decoder_forward(x, memory, tgt_mask, src_mask, prepped, num_heads):
    B, T, D = x.shape
    S = memory.shape[1]

    # additive masks (masked_fill(mask == 0, -1e9) equivalent), computed once per call
    tgt_bias = jnp.where(tgt_mask == 0, -1.0e9, 0.0).astype(jnp.float32)   # (T, T)
    src_bias = jnp.where(src_mask == 0, -1.0e9, 0.0).astype(jnp.float32)   # (T, S)

    operands = (x, memory, tgt_bias, src_bias,
                prepped["ln_gb"], prepped["bqkv"], prepped["outb"],
                prepped["wqkv"], prepped["wo"],
                prepped["w1"], prepped["b1"], prepped["w2"])

    in_specs = [pl.BlockSpec((1, T, D), lambda b: (b, 0, 0)),     # x (per-batch block)
                pl.BlockSpec((1, S, D), lambda b: (b, 0, 0))]     # memory (per-batch)
    in_specs += [_const_spec(op.shape) for op in operands[2:]]    # masks + packed weights

    kernel = functools.partial(decoder_layer_kernel, num_heads=num_heads)
    return pl.pallas_call(
        kernel,
        grid=(B,),
        in_specs=in_specs,
        out_specs=pl.BlockSpec((1, T, D), lambda b: (b, 0, 0)),
        out_shape=jax.ShapeDtypeStruct((B, T, D), jnp.float32),
        compiler_params=pltpu.CompilerParams(dimension_semantics=("parallel",)),
    )(*operands)


# --------------------------------------------------------------------------
# Parameter init (PyTorch-equivalent: xavier_uniform weights, zero biases)
# --------------------------------------------------------------------------
def xavier_uniform(key, shape):
    fan_out, fan_in = shape
    limit = math.sqrt(6.0 / (fan_in + fan_out))
    return jax.random.uniform(key, shape, jnp.float32, -limit, limit)


def init_attn_params(key, d_model):
    ks = jax.random.split(key, 4)
    z = jnp.zeros((d_model,), jnp.float32)
    return {"wq": xavier_uniform(ks[0], (d_model, d_model)), "bq": z,
            "wk": xavier_uniform(ks[1], (d_model, d_model)), "bk": z,
            "wv": xavier_uniform(ks[2], (d_model, d_model)), "bv": z,
            "wo": xavier_uniform(ks[3], (d_model, d_model)), "bo": z}


def init_decoder_params(key, d_model, d_ff):
    k_sa, k_ca, k_w1, k_w2 = jax.random.split(key, 4)
    ones = jnp.ones((d_model,), jnp.float32)
    zeros = jnp.zeros((d_model,), jnp.float32)
    return {
        "ln1_g": ones, "ln1_b": zeros,
        "ln2_g": ones, "ln2_b": zeros,
        "ln3_g": ones, "ln3_b": zeros,
        "self_attn": init_attn_params(k_sa, d_model),
        "src_attn": init_attn_params(k_ca, d_model),
        "w1": xavier_uniform(k_w1, (d_ff, d_model)), "b1": jnp.zeros((d_ff,), jnp.float32),
        "w2": xavier_uniform(k_w2, (d_model, d_ff)), "b2": zeros,
    }


# --------------------------------------------------------------------------
# Pure-JAX f32 reference (mirrors the PyTorch forward) for a sanity check
# --------------------------------------------------------------------------
def reference_decoder(x, memory, tgt_mask, src_mask, params, num_heads):
    def ln(v, g, b):
        mu = v.mean(-1, keepdims=True)
        var = ((v - mu) ** 2).mean(-1, keepdims=True)
        return (v - mu) / jnp.sqrt(var + 1e-12) * g + b

    def mha(q_in, kv_in, p, mask):
        B, T, D = q_in.shape
        S = kv_in.shape[1]
        H = num_heads
        dk = D // H
        q = (q_in @ p["wq"].T + p["bq"]).reshape(B, T, H, dk).transpose(0, 2, 1, 3)
        k = (kv_in @ p["wk"].T + p["bk"]).reshape(B, S, H, dk).transpose(0, 2, 1, 3)
        v = (kv_in @ p["wv"].T + p["bv"]).reshape(B, S, H, dk).transpose(0, 2, 1, 3)
        s = q @ k.transpose(0, 1, 3, 2) / math.sqrt(dk)
        s = jnp.where(mask[None, None] == 0, -1.0e9, s)
        w = jax.nn.softmax(s, axis=-1)
        o = (w @ v).transpose(0, 2, 1, 3).reshape(B, T, D)
        return o @ p["wo"].T + p["bo"]

    x = ln(x, params["ln1_g"], params["ln1_b"])
    x = x + mha(x, x, params["self_attn"], tgt_mask)
    x = ln(x, params["ln2_g"], params["ln2_b"])
    x = x + mha(x, memory, params["src_attn"], src_mask)
    x = ln(x, params["ln3_g"], params["ln3_b"])
    ff = jnp.maximum(x @ params["w1"].T + params["b1"], 0.0) @ params["w2"].T + params["b2"]
    return x + ff


# --------------------------------------------------------------------------
# Main
# --------------------------------------------------------------------------
if __name__ == "__main__":
    B, T, S = 2, 8, 16           # batch, target length, source(memory) length
    d_model, num_heads = 128, 4  # lane-dense d_model (multiple of 128)
    d_ff = 4 * d_model

    key = jax.random.PRNGKey(0)
    k_x, k_mem, k_params = jax.random.split(key, 3)
    x = jax.random.normal(k_x, (B, T, d_model), jnp.float32)
    memory = jax.random.normal(k_mem, (B, S, d_model), jnp.float32)
    tgt_mask = jnp.tril(jnp.ones((T, T), jnp.int32))   # causal self-attention mask
    src_mask = jnp.ones((T, S), jnp.int32)             # attend to all memory positions
    params = init_decoder_params(k_params, d_model, d_ff)

    # one-time weight re-layout (fused QKV, packed small operands, bf16 casts)
    prepped = prepare_decoder_params(params, num_heads)

    out = transformer_decoder_forward(x, memory, tgt_mask, src_mask, prepped,
                                      num_heads=num_heads)
    out = jax.block_until_ready(out)

    ref = reference_decoder(x, memory, tgt_mask, src_mask, params, num_heads)

    assert out.shape == (B, T, d_model)
    assert bool(jnp.all(jnp.isfinite(out)))
    max_err = float(jnp.max(jnp.abs(out - ref)))
    assert max_err < 0.25, f"max abs err vs f32 reference: {max_err}"
    print("KERNEL_OK")
</pallas_src>

<mosaic_0001>
module attributes {stable_mosaic.version = 11 : i64} {
  func.func @decoder_layer_kernel(%arg0: i32, %arg1: memref<1x8x128xf32, #tpu.memory_space<vmem>>, %arg2: memref<1x16x128xf32, #tpu.memory_space<vmem>>, %arg3: memref<8x8xf32, #tpu.memory_space<vmem>>, %arg4: memref<8x16xf32, #tpu.memory_space<vmem>>, %arg5: memref<6x128xf32, #tpu.memory_space<vmem>>, %arg6: memref<2x384xf32, #tpu.memory_space<vmem>>, %arg7: memref<3x128xf32, #tpu.memory_space<vmem>>, %arg8: memref<2x128x384xbf16, #tpu.memory_space<vmem>>, %arg9: memref<2x128x128xbf16, #tpu.memory_space<vmem>>, %arg10: memref<128x512xbf16, #tpu.memory_space<vmem>>, %arg11: memref<1x512xf32, #tpu.memory_space<vmem>>, %arg12: memref<512x128xbf16, #tpu.memory_space<vmem>>, %arg13: memref<1x8x128xf32, #tpu.memory_space<vmem>>) attributes {dimension_semantics = [#tpu.dimension_semantics<parallel>], iteration_bounds = array<i64: 2>, scalar_prefetch = 0 : i64, scratch_operands = 0 : i64, tpu.core_type = #tpu.core_type<tc>, window_params = [{transform_indices = @transform_0, window_bounds = array<i64: 1, 8, 128>}, {transform_indices = @transform_1, window_bounds = array<i64: 1, 16, 128>}, {pipeline_mode = #tpu.pipeline_mode<synchronous>, transform_indices = @transform_2, window_bounds = array<i64: 8, 8>}, {pipeline_mode = #tpu.pipeline_mode<synchronous>, transform_indices = @transform_3, window_bounds = array<i64: 8, 16>}, {pipeline_mode = #tpu.pipeline_mode<synchronous>, transform_indices = @transform_4, window_bounds = array<i64: 6, 128>}, {pipeline_mode = #tpu.pipeline_mode<synchronous>, transform_indices = @transform_5, window_bounds = array<i64: 2, 384>}, {pipeline_mode = #tpu.pipeline_mode<synchronous>, transform_indices = @transform_6, window_bounds = array<i64: 3, 128>}, {pipeline_mode = #tpu.pipeline_mode<synchronous>, transform_indices = @transform_7, window_bounds = array<i64: 2, 128, 384>}, {pipeline_mode = #tpu.pipeline_mode<synchronous>, transform_indices = @transform_8, window_bounds = array<i64: 2, 128, 128>}, {pipeline_mode = #tpu.pipeline_mode<synchronous>, transform_indices = @transform_9, window_bounds = array<i64: 128, 512>}, {pipeline_mode = #tpu.pipeline_mode<synchronous>, transform_indices = @transform_10, window_bounds = array<i64: 1, 512>}, {pipeline_mode = #tpu.pipeline_mode<synchronous>, transform_indices = @transform_11, window_bounds = array<i64: 512, 128>}, {transform_indices = @transform_12, window_bounds = array<i64: 1, 8, 128>}]} {
    %c0 = arith.constant 0 : index
    %c0_0 = arith.constant 0 : index
    %c0_1 = arith.constant 0 : index
    %0 = vector.load %arg1[%c0, %c0_0, %c0_1] : memref<1x8x128xf32, #tpu.memory_space<vmem>>, vector<1x8x128xf32>
    %1 = vector.shape_cast %0 : vector<1x8x128xf32> to vector<8x128xf32>
    %c0_2 = arith.constant 0 : index
    %c0_3 = arith.constant 0 : index
    %c0_4 = arith.constant 0 : index
    %2 = vector.load %arg2[%c0_2, %c0_3, %c0_4] : memref<1x16x128xf32, #tpu.memory_space<vmem>>, vector<1x16x128xf32>
    %3 = vector.shape_cast %2 : vector<1x16x128xf32> to vector<16x128xf32>
    %c0_5 = arith.constant 0 : index
    %c0_6 = arith.constant 0 : index
    %4 = vector.load %arg5[%c0_5, %c0_6] : memref<6x128xf32, #tpu.memory_space<vmem>>, vector<6x128xf32>
    %cst = arith.constant dense<0.000000e+00> : vector<8xf32>
    %5 = vector.multi_reduction <add>, %1, %cst [1] : vector<8x128xf32> to vector<8xf32>
    %6 = vector.shape_cast %5 : vector<8xf32> to vector<8x1xf32>
    %cst_7 = arith.constant 1.280000e+02 : f32
    %7 = vector.broadcast %cst_7 : f32 to vector<8x1xf32>
    %8 = arith.divf %6, %7 : vector<8x1xf32>
    %9 = arith.mulf %1, %1 : vector<8x128xf32>
    %cst_8 = arith.constant dense<0.000000e+00> : vector<8xf32>
    %10 = vector.multi_reduction <add>, %9, %cst_8 [1] : vector<8x128xf32> to vector<8xf32>
    %11 = vector.shape_cast %10 : vector<8xf32> to vector<8x1xf32>
    %cst_9 = arith.constant 1.280000e+02 : f32
    %12 = vector.broadcast %cst_9 : f32 to vector<8x1xf32>
    %13 = arith.divf %11, %12 : vector<8x1xf32>
    %14 = arith.mulf %8, %8 : vector<8x1xf32>
    %15 = arith.subf %13, %14 : vector<8x1xf32>
    %cst_10 = arith.constant 0.000000e+00 : f32
    %16 = vector.broadcast %cst_10 : f32 to vector<8x1xf32>
    %17 = arith.maximumf %15, %16 : vector<8x1xf32>
    %18 = vector.broadcast %8 : vector<8x1xf32> to vector<8x128xf32>
    %19 = arith.subf %1, %18 : vector<8x128xf32>
    %cst_11 = arith.constant 9.99999996E-13 : f32
    %20 = vector.broadcast %cst_11 : f32 to vector<8x1xf32>
    %21 = arith.addf %17, %20 : vector<8x1xf32>
    %22 = math.rsqrt %21 : vector<8x1xf32>
    %23 = vector.broadcast %22 : vector<8x1xf32> to vector<8x128xf32>
    %24 = arith.mulf %19, %23 : vector<8x128xf32>
    %25 = vector.extract_strided_slice %4 {offsets = [0, 0], sizes = [1, 128], strides = [1, 1]} : vector<6x128xf32> to vector<1x128xf32>
    %26 = vector.shape_cast %25 : vector<1x128xf32> to vector<128xf32>
    %27 = vector.shape_cast %26 : vector<128xf32> to vector<1x128xf32>
    %28 = vector.broadcast %27 : vector<1x128xf32> to vector<8x128xf32>
    %29 = arith.mulf %24, %28 : vector<8x128xf32>
    %30 = vector.extract_strided_slice %4 {offsets = [1, 0], sizes = [1, 128], strides = [1, 1]} : vector<6x128xf32> to vector<1x128xf32>
    %31 = vector.shape_cast %30 : vector<1x128xf32> to vector<128xf32>
    %32 = vector.shape_cast %31 : vector<128xf32> to vector<1x128xf32>
    %33 = vector.broadcast %32 : vector<1x128xf32> to vector<8x128xf32>
    %34 = arith.addf %29, %33 : vector<8x128xf32>
    %c0_12 = arith.constant 0 : index
    %c0_13 = arith.constant 0 : index
    %c0_14 = arith.constant 0 : index
    %35 = vector.load %arg8[%c0_12, %c0_13, %c0_14] : memref<2x128x384xbf16, #tpu.memory_space<vmem>>, vector<1x128x384xbf16>
    %36 = vector.shape_cast %35 : vector<1x128x384xbf16> to vector<128x384xbf16>
    %c0_15 = arith.constant 0 : index
    %c0_16 = arith.constant 0 : index
    %37 = vector.load %arg6[%c0_15, %c0_16] : memref<2x384xf32, #tpu.memory_space<vmem>>, vector<1x384xf32>
    %38 = vector.shape_cast %37 : vector<1x384xf32> to vector<384xf32>
    %c0_17 = arith.constant 0 : index
    %c0_18 = arith.constant 0 : index
    %c0_19 = arith.constant 0 : index
    %39 = vector.load %arg9[%c0_17, %c0_18, %c0_19] : memref<2x128x128xbf16, #tpu.memory_space<vmem>>, vector<1x128x128xbf16>
    %40 = vector.shape_cast %39 : vector<1x128x128xbf16> to vector<128x128xbf16>
    %c0_20 = arith.constant 0 : index
    %c0_21 = arith.constant 0 : index
    %41 = vector.load %arg7[%c0_20, %c0_21] : memref<3x128xf32, #tpu.memory_space<vmem>>, vector<1x128xf32>
    %42 = vector.shape_cast %41 : vector<1x128xf32> to vector<128xf32>
    %c0_22 = arith.constant 0 : index
    %c0_23 = arith.constant 0 : index
    %43 = vector.load %arg3[%c0_22, %c0_23] : memref<8x8xf32, #tpu.memory_space<vmem>>, vector<8x8xf32>
    %44 = arith.truncf %34 : vector<8x128xf32> to vector<8x128xbf16>
    %cst_24 = arith.constant dense<0.000000e+00> : vector<8x384xf32>
    %45 = tpu.matmul %44, %36, %cst_24 {dimension_numbers = #tpu.dot_dimension_numbers<[1], [0], [0], [1], [0, 0, 1, 1], [], []>} : vector<8x128xbf16>, vector<128x384xbf16>, vector<8x384xf32> -> vector<8x384xf32>
    %46 = vector.shape_cast %38 : vector<384xf32> to vector<1x384xf32>
    %47 = vector.broadcast %46 : vector<1x384xf32> to vector<8x384xf32>
    %48 = arith.addf %45, %47 : vector<8x384xf32>
    %49 = vector.extract_strided_slice %48 {offsets = [0, 0], sizes = [8, 128], strides = [1, 1]} : vector<8x384xf32> to vector<8x128xf32>
    %50 = vector.extract_strided_slice %48 {offsets = [0, 128], sizes = [8, 128], strides = [1, 1]} : vector<8x384xf32> to vector<8x128xf32>
    %51 = vector.extract_strided_slice %48 {offsets = [0, 256], sizes = [8, 128], strides = [1, 1]} : vector<8x384xf32> to vector<8x128xf32>
    %52 = arith.truncf %49 : vector<8x128xf32> to vector<8x128xbf16>
    %53 = vector.extract_strided_slice %52 {offsets = [0, 0], sizes = [8, 32], strides = [1, 1]} : vector<8x128xbf16> to vector<8x32xbf16>
    %54 = vector.extract_strided_slice %52 {offsets = [0, 32], sizes = [8, 32], strides = [1, 1]} : vector<8x128xbf16> to vector<8x32xbf16>
    %55 = vector.extract_strided_slice %52 {offsets = [0, 64], sizes = [8, 32], strides = [1, 1]} : vector<8x128xbf16> to vector<8x32xbf16>
    %56 = vector.extract_strided_slice %52 {offsets = [0, 96], sizes = [8, 32], strides = [1, 1]} : vector<8x128xbf16> to vector<8x32xbf16>
    %57 = vector.shape_cast %53 : vector<8x32xbf16> to vector<1x8x32xbf16>
    %58 = vector.shape_cast %54 : vector<8x32xbf16> to vector<1x8x32xbf16>
    %59 = vector.shape_cast %55 : vector<8x32xbf16> to vector<1x8x32xbf16>
    %60 = vector.shape_cast %56 : vector<8x32xbf16> to vector<1x8x32xbf16>
    %61 = tpu.concatenate %57, %58, %59, %60 in 0 : vector<1x8x32xbf16>, vector<1x8x32xbf16>, vector<1x8x32xbf16>, vector<1x8x32xbf16> -> vector<4x8x32xbf16>
    %62 = arith.truncf %50 : vector<8x128xf32> to vector<8x128xbf16>
    %63 = vector.extract_strided_slice %62 {offsets = [0, 0], sizes = [8, 32], strides = [1, 1]} : vector<8x128xbf16> to vector<8x32xbf16>
    %64 = vector.extract_strided_slice %62 {offsets = [0, 32], sizes = [8, 32], strides = [1, 1]} : vector<8x128xbf16> to vector<8x32xbf16>
    %65 = vector.extract_strided_slice %62 {offsets = [0, 64], sizes = [8, 32], strides = [1, 1]} : vector<8x128xbf16> to vector<8x32xbf16>
    %66 = vector.extract_strided_slice %62 {offsets = [0, 96], sizes = [8, 32], strides = [1, 1]} : vector<8x128xbf16> to vector<8x32xbf16>
    %67 = vector.shape_cast %63 : vector<8x32xbf16> to vector<1x8x32xbf16>
    %68 = vector.shape_cast %64 : vector<8x32xbf16> to vector<1x8x32xbf16>
    %69 = vector.shape_cast %65 : vector<8x32xbf16> to vector<1x8x32xbf16>
    %70 = vector.shape_cast %66 : vector<8x32xbf16> to vector<1x8x32xbf16>
    %71 = tpu.concatenate %67, %68, %69, %70 in 0 : vector<1x8x32xbf16>, vector<1x8x32xbf16>, vector<1x8x32xbf16>, vector<1x8x32xbf16> -> vector<4x8x32xbf16>
    %72 = arith.truncf %51 : vector<8x128xf32> to vector<8x128xbf16>
    %73 = vector.extract_strided_slice %72 {offsets = [0, 0], sizes = [8, 32], strides = [1, 1]} : vector<8x128xbf16> to vector<8x32xbf16>
    %74 = vector.extract_strided_slice %72 {offsets = [0, 32], sizes = [8, 32], strides = [1, 1]} : vector<8x128xbf16> to vector<8x32xbf16>
    %75 = vector.extract_strided_slice %72 {offsets = [0, 64], sizes = [8, 32], strides = [1, 1]} : vector<8x128xbf16> to vector<8x32xbf16>
    %76 = vector.extract_strided_slice %72 {offsets = [0, 96], sizes = [8, 32], strides = [1, 1]} : vector<8x128xbf16> to vector<8x32xbf16>
    %77 = vector.shape_cast %73 : vector<8x32xbf16> to vector<1x8x32xbf16>
    %78 = vector.shape_cast %74 : vector<8x32xbf16> to vector<1x8x32xbf16>
    %79 = vector.shape_cast %75 : vector<8x32xbf16> to vector<1x8x32xbf16>
    %80 = vector.shape_cast %76 : vector<8x32xbf16> to vector<1x8x32xbf16>
    %81 = tpu.concatenate %77, %78, %79, %80 in 0 : vector<1x8x32xbf16>, vector<1x8x32xbf16>, vector<1x8x32xbf16>, vector<1x8x32xbf16> -> vector<4x8x32xbf16>
    "tpu.trace_start"() <{level = 10 : i32, message = "htf,hsf->hts"}> : () -> ()
    %cst_25 = arith.constant dense<0.000000e+00> : vector<4x8x8xf32>
    %82 = tpu.matmul %61, %71, %cst_25 {dimension_numbers = #tpu.dot_dimension_numbers<[2], [2], [1], [1], [0, 0, 0, 1, 1, 1], [0], [0]>} : vector<4x8x32xbf16>, vector<4x8x32xbf16>, vector<4x8x8xf32> -> vector<4x8x8xf32>
    "tpu.trace_stop"() : () -> ()
    %83 = vector.shape_cast %43 : vector<8x8xf32> to vector<1x8x8xf32>
    %84 = vector.broadcast %83 : vector<1x8x8xf32> to vector<4x8x8xf32>
    %85 = arith.addf %82, %84 : vector<4x8x8xf32>
    %cst_26 = arith.constant dense<0xFF800000> : vector<4x8xf32>
    %86 = vector.multi_reduction <maximumf>, %85, %cst_26 [2] : vector<4x8x8xf32> to vector<4x8xf32>
    %87 = vector.shape_cast %86 : vector<4x8xf32> to vector<4x8x1xf32>
    %88 = vector.broadcast %87 : vector<4x8x1xf32> to vector<4x8x8xf32>
    %89 = arith.subf %85, %88 : vector<4x8x8xf32>
    %90 = math.exp %89 : vector<4x8x8xf32>
    %cst_27 = arith.constant dense<0.000000e+00> : vector<4x8xf32>
    %91 = vector.multi_reduction <add>, %90, %cst_27 [2] : vector<4x8x8xf32> to vector<4x8xf32>
    %92 = vector.shape_cast %91 : vector<4x8xf32> to vector<4x8x1xf32>
    %93 = tpu.reciprocal %92 {approx = true} : vector<4x8x1xf32> -> vector<4x8x1xf32>
    %94 = vector.broadcast %93 : vector<4x8x1xf32> to vector<4x8x8xf32>
    %95 = arith.mulf %90, %94 : vector<4x8x8xf32>
    %96 = arith.truncf %95 : vector<4x8x8xf32> to vector<4x8x8xbf16>
    "tpu.trace_start"() <{level = 10 : i32, message = "hts,hsf->htf"}> : () -> ()
    %cst_28 = arith.constant dense<0.000000e+00> : vector<4x8x32xf32>
    %97 = tpu.matmul %96, %81, %cst_28 {dimension_numbers = #tpu.dot_dimension_numbers<[2], [1], [1], [2], [0, 0, 0, 1, 1, 2], [0], [0]>} : vector<4x8x8xbf16>, vector<4x8x32xbf16>, vector<4x8x32xf32> -> vector<4x8x32xf32>
    "tpu.trace_stop"() : () -> ()
    %98 = vector.extract_strided_slice %97 {offsets = [0, 0, 0], sizes = [1, 8, 32], strides = [1, 1, 1]} : vector<4x8x32xf32> to vector<1x8x32xf32>
    %99 = vector.shape_cast %98 : vector<1x8x32xf32> to vector<8x32xf32>
    %100 = vector.extract_strided_slice %97 {offsets = [1, 0, 0], sizes = [1, 8, 32], strides = [1, 1, 1]} : vector<4x8x32xf32> to vector<1x8x32xf32>
    %101 = vector.shape_cast %100 : vector<1x8x32xf32> to vector<8x32xf32>
    %102 = vector.extract_strided_slice %97 {offsets = [2, 0, 0], sizes = [1, 8, 32], strides = [1, 1, 1]} : vector<4x8x32xf32> to vector<1x8x32xf32>
    %103 = vector.shape_cast %102 : vector<1x8x32xf32> to vector<8x32xf32>
    %104 = vector.extract_strided_slice %97 {offsets = [3, 0, 0], sizes = [1, 8, 32], strides = [1, 1, 1]} : vector<4x8x32xf32> to vector<1x8x32xf32>
    %105 = vector.shape_cast %104 : vector<1x8x32xf32> to vector<8x32xf32>
    %106 = tpu.concatenate %99, %101, %103, %105 in 1 : vector<8x32xf32>, vector<8x32xf32>, vector<8x32xf32>, vector<8x32xf32> -> vector<8x128xf32>
    %107 = arith.truncf %106 : vector<8x128xf32> to vector<8x128xbf16>
    %cst_29 = arith.constant dense<0.000000e+00> : vector<8x128xf32>
    %108 = tpu.matmul %107, %40, %cst_29 {dimension_numbers = #tpu.dot_dimension_numbers<[1], [0], [0], [1], [0, 0, 1, 1], [], []>} : vector<8x128xbf16>, vector<128x128xbf16>, vector<8x128xf32> -> vector<8x128xf32>
    %109 = vector.shape_cast %42 : vector<128xf32> to vector<1x128xf32>
    %110 = vector.broadcast %109 : vector<1x128xf32> to vector<8x128xf32>
    %111 = arith.addf %108, %110 : vector<8x128xf32>
    %112 = arith.addf %34, %111 : vector<8x128xf32>
    %cst_30 = arith.constant dense<0.000000e+00> : vector<8xf32>
    %113 = vector.multi_reduction <add>, %112, %cst_30 [1] : vector<8x128xf32> to vector<8xf32>
    %114 = vector.shape_cast %113 : vector<8xf32> to vector<8x1xf32>
    %cst_31 = arith.constant 1.280000e+02 : f32
    %115 = vector.broadcast %cst_31 : f32 to vector<8x1xf32>
    %116 = arith.divf %114, %115 : vector<8x1xf32>
    %117 = arith.mulf %112, %112 : vector<8x128xf32>
    %cst_32 = arith.constant dense<0.000000e+00> : vector<8xf32>
    %118 = vector.multi_reduction <add>, %117, %cst_32 [1] : vector<8x128xf32> to vector<8xf32>
    %119 = vector.shape_cast %118 : vector<8xf32> to vector<8x1xf32>
    %cst_33 = arith.constant 1.280000e+02 : f32
    %120 = vector.broadcast %cst_33 : f32 to vector<8x1xf32>
    %121 = arith.divf %119, %120 : vector<8x1xf32>
    %122 = arith.mulf %116, %116 : vector<8x1xf32>
    %123 = arith.subf %121, %122 : vector<8x1xf32>
    %cst_34 = arith.constant 0.000000e+00 : f32
    %124 = vector.broadcast %cst_34 : f32 to vector<8x1xf32>
    %125 = arith.maximumf %123, %124 : vector<8x1xf32>
    %126 = vector.broadcast %116 : vector<8x1xf32> to vector<8x128xf32>
    %127 = arith.subf %112, %126 : vector<8x128xf32>
    %cst_35 = arith.constant 9.99999996E-13 : f32
    %128 = vector.broadcast %cst_35 : f32 to vector<8x1xf32>
    %129 = arith.addf %125, %128 : vector<8x1xf32>
    %130 = math.rsqrt %129 : vector<8x1xf32>
    %131 = vector.broadcast %130 : vector<8x1xf32> to vector<8x128xf32>
    %132 = arith.mulf %127, %131 : vector<8x128xf32>
    %133 = vector.extract_strided_slice %4 {offsets = [2, 0], sizes = [1, 128], strides = [1, 1]} : vector<6x128xf32> to vector<1x128xf32>
    %134 = vector.shape_cast %133 : vector<1x128xf32> to vector<128xf32>
    %135 = vector.shape_cast %134 : vector<128xf32> to vector<1x128xf32>
    %136 = vector.broadcast %135 : vector<1x128xf32> to vector<8x128xf32>
    %137 = arith.mulf %132, %136 : vector<8x128xf32>
    %138 = vector.extract_strided_slice %4 {offsets = [3, 0], sizes = [1, 128], strides = [1, 1]} : vector<6x128xf32> to vector<1x128xf32>
    %139 = vector.shape_cast %138 : vector<1x128xf32> to vector<128xf32>
    %140 = vector.shape_cast %139 : vector<128xf32> to vector<1x128xf32>
    %141 = vector.broadcast %140 : vector<1x128xf32> to vector<8x128xf32>
    %142 = arith.addf %137, %141 : vector<8x128xf32>
    %c1 = arith.constant 1 : index
    %c0_36 = arith.constant 0 : index
    %c0_37 = arith.constant 0 : index
    %143 = vector.load %arg8[%c1, %c0_36, %c0_37] : memref<2x128x384xbf16, #tpu.memory_space<vmem>>, vector<1x128x384xbf16>
    %144 = vector.shape_cast %143 : vector<1x128x384xbf16> to vector<128x384xbf16>
    %c1_38 = arith.constant 1 : index
    %c0_39 = arith.constant 0 : index
    %145 = vector.load %arg6[%c1_38, %c0_39] : memref<2x384xf32, #tpu.memory_space<vmem>>, vector<1x384xf32>
    %146 = vector.shape_cast %145 : vector<1x384xf32> to vector<384xf32>
    %c1_40 = arith.constant 1 : index
    %c0_41 = arith.constant 0 : index
    %c0_42 = arith.constant 0 : index
    %147 = vector.load %arg9[%c1_40, %c0_41, %c0_42] : memref<2x128x128xbf16, #tpu.memory_space<vmem>>, vector<1x128x128xbf16>
    %148 = vector.shape_cast %147 : vector<1x128x128xbf16> to vector<128x128xbf16>
    %c1_43 = arith.constant 1 : index
    %c0_44 = arith.constant 0 : index
    %149 = vector.load %arg7[%c1_43, %c0_44] : memref<3x128xf32, #tpu.memory_space<vmem>>, vector<1x128xf32>
    %150 = vector.shape_cast %149 : vector<1x128xf32> to vector<128xf32>
    %c0_45 = arith.constant 0 : index
    %c0_46 = arith.constant 0 : index
    %151 = vector.load %arg4[%c0_45, %c0_46] : memref<8x16xf32, #tpu.memory_space<vmem>>, vector<8x16xf32>
    %152 = arith.truncf %142 : vector<8x128xf32> to vector<8x128xbf16>
    %153 = arith.truncf %3 : vector<16x128xf32> to vector<16x128xbf16>
    %154 = vector.extract_strided_slice %144 {offsets = [0, 0], sizes = [128, 128], strides = [1, 1]} : vector<128x384xbf16> to vector<128x128xbf16>
    %cst_47 = arith.constant dense<0.000000e+00> : vector<8x128xf32>
    %155 = tpu.matmul %152, %154, %cst_47 {dimension_numbers = #tpu.dot_dimension_numbers<[1], [0], [0], [1], [0, 0, 1, 1], [], []>} : vector<8x128xbf16>, vector<128x128xbf16>, vector<8x128xf32> -> vector<8x128xf32>
    %156 = vector.extract_strided_slice %146 {offsets = [0], sizes = [128], strides = [1]} : vector<384xf32> to vector<128xf32>
    %157 = vector.shape_cast %156 : vector<128xf32> to vector<1x128xf32>
    %158 = vector.broadcast %157 : vector<1x128xf32> to vector<8x128xf32>
    %159 = arith.addf %155, %158 : vector<8x128xf32>
    %160 = vector.extract_strided_slice %144 {offsets = [0, 128], sizes = [128, 256], strides = [1, 1]} : vector<128x384xbf16> to vector<128x256xbf16>
    %cst_48 = arith.constant dense<0.000000e+00> : vector<16x256xf32>
    %161 = tpu.matmul %153, %160, %cst_48 {dimension_numbers = #tpu.dot_dimension_numbers<[1], [0], [0], [1], [0, 0, 1, 1], [], []>} : vector<16x128xbf16>, vector<128x256xbf16>, vector<16x256xf32> -> vector<16x256xf32>
    %162 = vector.extract_strided_slice %146 {offsets = [128], sizes = [256], strides = [1]} : vector<384xf32> to vector<256xf32>
    %163 = vector.shape_cast %162 : vector<256xf32> to vector<1x256xf32>
    %164 = vector.broadcast %163 : vector<1x256xf32> to vector<16x256xf32>
    %165 = arith.addf %161, %164 : vector<16x256xf32>
    %166 = vector.extract_strided_slice %165 {offsets = [0, 0], sizes = [16, 128], strides = [1, 1]} : vector<16x256xf32> to vector<16x128xf32>
    %167 = vector.extract_strided_slice %165 {offsets = [0, 128], sizes = [16, 128], strides = [1, 1]} : vector<16x256xf32> to vector<16x128xf32>
    %168 = arith.truncf %159 : vector<8x128xf32> to vector<8x128xbf16>
    %169 = vector.extract_strided_slice %168 {offsets = [0, 0], sizes = [8, 32], strides = [1, 1]} : vector<8x128xbf16> to vector<8x32xbf16>
    %170 = vector.extract_strided_slice %168 {offsets = [0, 32], sizes = [8, 32], strides = [1, 1]} : vector<8x128xbf16> to vector<8x32xbf16>
    %171 = vector.extract_strided_slice %168 {offsets = [0, 64], sizes = [8, 32], strides = [1, 1]} : vector<8x128xbf16> to vector<8x32xbf16>
    %172 = vector.extract_strided_slice %168 {offsets = [0, 96], sizes = [8, 32], strides = [1, 1]} : vector<8x128xbf16> to vector<8x32xbf16>
    %173 = vector.shape_cast %169 : vector<8x32xbf16> to vector<1x8x32xbf16>
    %174 = vector.shape_cast %170 : vector<8x32xbf16> to vector<1x8x32xbf16>
    %175 = vector.shape_cast %171 : vector<8x32xbf16> to vector<1x8x32xbf16>
    %176 = vector.shape_cast %172 : vector<8x32xbf16> to vector<1x8x32xbf16>
    %177 = tpu.concatenate %173, %174, %175, %176 in 0 : vector<1x8x32xbf16>, vector<1x8x32xbf16>, vector<1x8x32xbf16>, vector<1x8x32xbf16> -> vector<4x8x32xbf16>
    %178 = arith.truncf %166 : vector<16x128xf32> to vector<16x128xbf16>
    %179 = vector.extract_strided_slice %178 {offsets = [0, 0], sizes = [16, 32], strides = [1, 1]} : vector<16x128xbf16> to vector<16x32xbf16>
    %180 = vector.extract_strided_slice %178 {offsets = [0, 32], sizes = [16, 32], strides = [1, 1]} : vector<16x128xbf16> to vector<16x32xbf16>
    %181 = vector.extract_strided_slice %178 {offsets = [0, 64], sizes = [16, 32], strides = [1, 1]} : vector<16x128xbf16> to vector<16x32xbf16>
    %182 = vector.extract_strided_slice %178 {offsets = [0, 96], sizes = [16, 32], strides = [1, 1]} : vector<16x128xbf16> to vector<16x32xbf16>
    %183 = vector.shape_cast %179 : vector<16x32xbf16> to vector<1x16x32xbf16>
    %184 = vector.shape_cast %180 : vector<16x32xbf16> to vector<1x16x32xbf16>
    %185 = vector.shape_cast %181 : vector<16x32xbf16> to vector<1x16x32xbf16>
    %186 = vector.shape_cast %182 : vector<16x32xbf16> to vector<1x16x32xbf16>
    %187 = tpu.concatenate %183, %184, %185, %186 in 0 : vector<1x16x32xbf16>, vector<1x16x32xbf16>, vector<1x16x32xbf16>, vector<1x16x32xbf16> -> vector<4x16x32xbf16>
    %188 = arith.truncf %167 : vector<16x128xf32> to vector<16x128xbf16>
    %189 = vector.extract_strided_slice %188 {offsets = [0, 0], sizes = [16, 32], strides = [1, 1]} : vector<16x128xbf16> to vector<16x32xbf16>
    %190 = vector.extract_strided_slice %188 {offsets = [0, 32], sizes = [16, 32], strides = [1, 1]} : vector<16x128xbf16> to vector<16x32xbf16>
    %191 = vector.extract_strided_slice %188 {offsets = [0, 64], sizes = [16, 32], strides = [1, 1]} : vector<16x128xbf16> to vector<16x32xbf16>
    %192 = vector.extract_strided_slice %188 {offsets = [0, 96], sizes = [16, 32], strides = [1, 1]} : vector<16x128xbf16> to vector<16x32xbf16>
    %193 = vector.shape_cast %189 : vector<16x32xbf16> to vector<1x16x32xbf16>
    %194 = vector.shape_cast %190 : vector<16x32xbf16> to vector<1x16x32xbf16>
    %195 = vector.shape_cast %191 : vector<16x32xbf16> to vector<1x16x32xbf16>
    %196 = vector.shape_cast %192 : vector<16x32xbf16> to vector<1x16x32xbf16>
    %197 = tpu.concatenate %193, %194, %195, %196 in 0 : vector<1x16x32xbf16>, vector<1x16x32xbf16>, vector<1x16x32xbf16>, vector<1x16x32xbf16> -> vector<4x16x32xbf16>
    "tpu.trace_start"() <{level = 10 : i32, message = "htf,hsf->hts"}> : () -> ()
    %cst_49 = arith.constant dense<0.000000e+00> : vector<4x8x16xf32>
    %198 = tpu.matmul %177, %187, %cst_49 {dimension_numbers = #tpu.dot_dimension_numbers<[2], [2], [1], [1], [0, 0, 0, 1, 1, 1], [0], [0]>} : vector<4x8x32xbf16>, vector<4x16x32xbf16>, vector<4x8x16xf32> -> vector<4x8x16xf32>
    "tpu.trace_stop"() : () -> ()
    %199 = vector.shape_cast %151 : vector<8x16xf32> to vector<1x8x16xf32>
    %200 = vector.broadcast %199 : vector<1x8x16xf32> to vector<4x8x16xf32>
    %201 = arith.addf %198, %200 : vector<4x8x16xf32>
    %cst_50 = arith.constant dense<0xFF800000> : vector<4x8xf32>
    %202 = vector.multi_reduction <maximumf>, %201, %cst_50 [2] : vector<4x8x16xf32> to vector<4x8xf32>
    %203 = vector.shape_cast %202 : vector<4x8xf32> to vector<4x8x1xf32>
    %204 = vector.broadcast %203 : vector<4x8x1xf32> to vector<4x8x16xf32>
    %205 = arith.subf %201, %204 : vector<4x8x16xf32>
    %206 = math.exp %205 : vector<4x8x16xf32>
    %cst_51 = arith.constant dense<0.000000e+00> : vector<4x8xf32>
    %207 = vector.multi_reduction <add>, %206, %cst_51 [2] : vector<4x8x16xf32> to vector<4x8xf32>
    %208 = vector.shape_cast %207 : vector<4x8xf32> to vector<4x8x1xf32>
    %209 = tpu.reciprocal %208 {approx = true} : vector<4x8x1xf32> -> vector<4x8x1xf32>
    %210 = vector.broadcast %209 : vector<4x8x1xf32> to vector<4x8x16xf32>
    %211 = arith.mulf %206, %210 : vector<4x8x16xf32>
    %212 = arith.truncf %211 : vector<4x8x16xf32> to vector<4x8x16xbf16>
    "tpu.trace_start"() <{level = 10 : i32, message = "hts,hsf->htf"}> : () -> ()
    %cst_52 = arith.constant dense<0.000000e+00> : vector<4x8x32xf32>
    %213 = tpu.matmul %212, %197, %cst_52 {dimension_numbers = #tpu.dot_dimension_numbers<[2], [1], [1], [2], [0, 0, 0, 1, 1, 2], [0], [0]>} : vector<4x8x16xbf16>, vector<4x16x32xbf16>, vector<4x8x32xf32> -> vector<4x8x32xf32>
    "tpu.trace_stop"() : () -> ()
    %214 = vector.extract_strided_slice %213 {offsets = [0, 0, 0], sizes = [1, 8, 32], strides = [1, 1, 1]} : vector<4x8x32xf32> to vector<1x8x32xf32>
    %215 = vector.shape_cast %214 : vector<1x8x32xf32> to vector<8x32xf32>
    %216 = vector.extract_strided_slice %213 {offsets = [1, 0, 0], sizes = [1, 8, 32], strides = [1, 1, 1]} : vector<4x8x32xf32> to vector<1x8x32xf32>
    %217 = vector.shape_cast %216 : vector<1x8x32xf32> to vector<8x32xf32>
    %218 = vector.extract_strided_slice %213 {offsets = [2, 0, 0], sizes = [1, 8, 32], strides = [1, 1, 1]} : vector<4x8x32xf32> to vector<1x8x32xf32>
    %219 = vector.shape_cast %218 : vector<1x8x32xf32> to vector<8x32xf32>
    %220 = vector.extract_strided_slice %213 {offsets = [3, 0, 0], sizes = [1, 8, 32], strides = [1, 1, 1]} : vector<4x8x32xf32> to vector<1x8x32xf32>
    %221 = vector.shape_cast %220 : vector<1x8x32xf32> to vector<8x32xf32>
    %222 = tpu.concatenate %215, %217, %219, %221 in 1 : vector<8x32xf32>, vector<8x32xf32>, vector<8x32xf32>, vector<8x32xf32> -> vector<8x128xf32>
    %223 = arith.truncf %222 : vector<8x128xf32> to vector<8x128xbf16>
    %cst_53 = arith.constant dense<0.000000e+00> : vector<8x128xf32>
    %224 = tpu.matmul %223, %148, %cst_53 {dimension_numbers = #tpu.dot_dimension_numbers<[1], [0], [0], [1], [0, 0, 1, 1], [], []>} : vector<8x128xbf16>, vector<128x128xbf16>, vector<8x128xf32> -> vector<8x128xf32>
    %225 = vector.shape_cast %150 : vector<128xf32> to vector<1x128xf32>
    %226 = vector.broadcast %225 : vector<1x128xf32> to vector<8x128xf32>
    %227 = arith.addf %224, %226 : vector<8x128xf32>
    %228 = arith.addf %142, %227 : vector<8x128xf32>
    %cst_54 = arith.constant dense<0.000000e+00> : vector<8xf32>
    %229 = vector.multi_reduction <add>, %228, %cst_54 [1] : vector<8x128xf32> to vector<8xf32>
    %230 = vector.shape_cast %229 : vector<8xf32> to vector<8x1xf32>
    %cst_55 = arith.constant 1.280000e+02 : f32
    %231 = vector.broadcast %cst_55 : f32 to vector<8x1xf32>
    %232 = arith.divf %230, %231 : vector<8x1xf32>
    %233 = arith.mulf %228, %228 : vector<8x128xf32>
    %cst_56 = arith.constant dense<0.000000e+00> : vector<8xf32>
    %234 = vector.multi_reduction <add>, %233, %cst_56 [1] : vector<8x128xf32> to vector<8xf32>
    %235 = vector.shape_cast %234 : vector<8xf32> to vector<8x1xf32>
    %cst_57 = arith.constant 1.280000e+02 : f32
    %236 = vector.broadcast %cst_57 : f32 to vector<8x1xf32>
    %237 = arith.divf %235, %236 : vector<8x1xf32>
    %238 = arith.mulf %232, %232 : vector<8x1xf32>
    %239 = arith.subf %237, %238 : vector<8x1xf32>
    %cst_58 = arith.constant 0.000000e+00 : f32
    %240 = vector.broadcast %cst_58 : f32 to vector<8x1xf32>
    %241 = arith.maximumf %239, %240 : vector<8x1xf32>
    %242 = vector.broadcast %232 : vector<8x1xf32> to vector<8x128xf32>
    %243 = arith.subf %228, %242 : vector<8x128xf32>
    %cst_59 = arith.constant 9.99999996E-13 : f32
    %244 = vector.broadcast %cst_59 : f32 to vector<8x1xf32>
    %245 = arith.addf %241, %244 : vector<8x1xf32>
    %246 = math.rsqrt %245 : vector<8x1xf32>
    %247 = vector.broadcast %246 : vector<8x1xf32> to vector<8x128xf32>
    %248 = arith.mulf %243, %247 : vector<8x128xf32>
    %249 = vector.extract_strided_slice %4 {offsets = [4, 0], sizes = [1, 128], strides = [1, 1]} : vector<6x128xf32> to vector<1x128xf32>
    %250 = vector.shape_cast %249 : vector<1x128xf32> to vector<128xf32>
    %251 = vector.shape_cast %250 : vector<128xf32> to vector<1x128xf32>
    %252 = vector.broadcast %251 : vector<1x128xf32> to vector<8x128xf32>
    %253 = arith.mulf %248, %252 : vector<8x128xf32>
    %254 = vector.extract_strided_slice %4 {offsets = [5, 0], sizes = [1, 128], strides = [1, 1]} : vector<6x128xf32> to vector<1x128xf32>
    %255 = vector.shape_cast %254 : vector<1x128xf32> to vector<128xf32>
    %256 = vector.shape_cast %255 : vector<128xf32> to vector<1x128xf32>
    %257 = vector.broadcast %256 : vector<1x128xf32> to vector<8x128xf32>
    %258 = arith.addf %253, %257 : vector<8x128xf32>
    %259 = arith.truncf %258 : vector<8x128xf32> to vector<8x128xbf16>
    %c0_60 = arith.constant 0 : index
    %c0_61 = arith.constant 0 : index
    %260 = vector.load %arg10[%c0_60, %c0_61] : memref<128x512xbf16, #tpu.memory_space<vmem>>, vector<128x512xbf16>
    %cst_62 = arith.constant dense<0.000000e+00> : vector<8x512xf32>
    %261 = tpu.matmul %259, %260, %cst_62 {dimension_numbers = #tpu.dot_dimension_numbers<[1], [0], [0], [1], [0, 0, 1, 1], [], []>} : vector<8x128xbf16>, vector<128x512xbf16>, vector<8x512xf32> -> vector<8x512xf32>
    %c0_63 = arith.constant 0 : index
    %c0_64 = arith.constant 0 : index
    %262 = vector.load %arg11[%c0_63, %c0_64] : memref<1x512xf32, #tpu.memory_space<vmem>>, vector<1x512xf32>
    %263 = vector.shape_cast %262 : vector<1x512xf32> to vector<512xf32>
    %264 = vector.shape_cast %263 : vector<512xf32> to vector<1x512xf32>
    %265 = vector.broadcast %264 : vector<1x512xf32> to vector<8x512xf32>
    %266 = arith.addf %261, %265 : vector<8x512xf32>
    %cst_65 = arith.constant 0.000000e+00 : f32
    %267 = vector.broadcast %cst_65 : f32 to vector<8x512xf32>
    %268 = arith.maximumf %266, %267 : vector<8x512xf32>
    %269 = arith.truncf %268 : vector<8x512xf32> to vector<8x512xbf16>
    %c0_66 = arith.constant 0 : index
    %c0_67 = arith.constant 0 : index
    %270 = vector.load %arg12[%c0_66, %c0_67] : memref<512x128xbf16, #tpu.memory_space<vmem>>, vector<512x128xbf16>
    %cst_68 = arith.constant dense<0.000000e+00> : vector<8x128xf32>
    %271 = tpu.matmul %269, %270, %cst_68 {dimension_numbers = #tpu.dot_dimension_numbers<[1], [0], [0], [1], [0, 0, 1, 1], [], []>} : vector<8x512xbf16>, vector<512x128xbf16>, vector<8x128xf32> -> vector<8x128xf32>
    %c2 = arith.constant 2 : index
    %c0_69 = arith.constant 0 : index
    %272 = vector.load %arg7[%c2, %c0_69] : memref<3x128xf32, #tpu.memory_space<vmem>>, vector<1x128xf32>
    %273 = vector.shape_cast %272 : vector<1x128xf32> to vector<128xf32>
    %274 = vector.shape_cast %273 : vector<128xf32> to vector<1x128xf32>
    %275 = vector.broadcast %274 : vector<1x128xf32> to vector<8x128xf32>
    %276 = arith.addf %271, %275 : vector<8x128xf32>
    %277 = arith.addf %258, %276 : vector<8x128xf32>
    %c0_70 = arith.constant 0 : index
    %c0_71 = arith.constant 0 : index
    %c0_72 = arith.constant 0 : index
    %278 = vector.load %arg13[%c0_70, %c0_71, %c0_72] : memref<1x8x128xf32, #tpu.memory_space<vmem>>, vector<1x8x128xf32>
    %279 = vector.shape_cast %278 : vector<1x8x128xf32> to vector<8x128xf32>
    %280 = vector.shape_cast %277 : vector<8x128xf32> to vector<1x8x128xf32>
    tpu.vector_store %arg13[%c0_70, %c0_71, %c0_72], %280 {strides = array<i32>} : memref<1x8x128xf32, #tpu.memory_space<vmem>>, vector<1x8x128xf32>,
    return
  }
  func.func @transform_0(%arg0: i32) -> (i32, i32, i32) {
    %c0_i32 = arith.constant 0 : i32
    %c0_i32_0 = arith.constant 0 : i32
    %c0_i32_1 = arith.constant 0 : i32
    return %arg0, %c0_i32, %c0_i32_0 : i32, i32, i32
  }
  func.func @transform_1(%arg0: i32) -> (i32, i32, i32) {
    %c0_i32 = arith.constant 0 : i32
    %c0_i32_0 = arith.constant 0 : i32
    %c0_i32_1 = arith.constant 0 : i32
    return %arg0, %c0_i32, %c0_i32_0 : i32, i32, i32
  }
  func.func @transform_2(%arg0: i32) -> (i32, i32) {
    %c0_i32 = arith.constant 0 : i32
    %c0_i32_0 = arith.constant 0 : i32
    %c0_i32_1 = arith.constant 0 : i32
    return %c0_i32, %c0_i32_0 : i32, i32
  }
  func.func @transform_3(%arg0: i32) -> (i32, i32) {
    %c0_i32 = arith.constant 0 : i32
    %c0_i32_0 = arith.constant 0 : i32
    %c0_i32_1 = arith.constant 0 : i32
    return %c0_i32, %c0_i32_0 : i32, i32
  }
  func.func @transform_4(%arg0: i32) -> (i32, i32) {
    %c0_i32 = arith.constant 0 : i32
    %c0_i32_0 = arith.constant 0 : i32
    %c0_i32_1 = arith.constant 0 : i32
    return %c0_i32, %c0_i32_0 : i32, i32
  }
  func.func @transform_5(%arg0: i32) -> (i32, i32) {
    %c0_i32 = arith.constant 0 : i32
    %c0_i32_0 = arith.constant 0 : i32
    %c0_i32_1 = arith.constant 0 : i32
    return %c0_i32, %c0_i32_0 : i32, i32
  }
  func.func @transform_6(%arg0: i32) -> (i32, i32) {
    %c0_i32 = arith.constant 0 : i32
    %c0_i32_0 = arith.constant 0 : i32
    %c0_i32_1 = arith.constant 0 : i32
    return %c0_i32, %c0_i32_0 : i32, i32
  }
  func.func @transform_7(%arg0: i32) -> (i32, i32, i32) {
    %c0_i32 = arith.constant 0 : i32
    %c0_i32_0 = arith.constant 0 : i32
    %c0_i32_1 = arith.constant 0 : i32
    %c0_i32_2 = arith.constant 0 : i32
    return %c0_i32, %c0_i32_0, %c0_i32_1 : i32, i32, i32
  }
  func.func @transform_8(%arg0: i32) -> (i32, i32, i32) {
    %c0_i32 = arith.constant 0 : i32
    %c0_i32_0 = arith.constant 0 : i32
    %c0_i32_1 = arith.constant 0 : i32
    %c0_i32_2 = arith.constant 0 : i32
    return %c0_i32, %c0_i32_0, %c0_i32_1 : i32, i32, i32
  }
  func.func @transform_9(%arg0: i32) -> (i32, i32) {
    %c0_i32 = arith.constant 0 : i32
    %c0_i32_0 = arith.constant 0 : i32
    %c0_i32_1 = arith.constant 0 : i32
    return %c0_i32, %c0_i32_0 : i32, i32
  }
  func.func @transform_10(%arg0: i32) -> (i32, i32) {
    %c0_i32 = arith.constant 0 : i32
    %c0_i32_0 = arith.constant 0 : i32
    %c0_i32_1 = arith.constant 0 : i32
    return %c0_i32, %c0_i32_0 : i32, i32
  }
  func.func @transform_11(%arg0: i32) -> (i32, i32) {
    %c0_i32 = arith.constant 0 : i32
    %c0_i32_0 = arith.constant 0 : i32
    %c0_i32_1 = arith.constant 0 : i32
    return %c0_i32, %c0_i32_0 : i32, i32
  }
  func.func @transform_12(%arg0: i32) -> (i32, i32, i32) {
    %c0_i32 = arith.constant 0 : i32
    %c0_i32_0 = arith.constant 0 : i32
    %c0_i32_1 = arith.constant 0 : i32
    return %arg0, %c0_i32, %c0_i32_0 : i32, i32, i32
  }
}

</mosaic_0001>

<bundles_post_ra>
// kernel: transformer_decoder_forward.1
= control target key start
LH: loop header
LB: loop body
LE: loop exit
PB: predicated region body
PF: predicated region fallthrough
CT: control target
= control target key end

     0   :  { %s4082_s0 = inlined_call_operand.vmem [shape: f32[2,8,128], index: 0, kind: input, shape index: {}]   ;;  %s4083_s1 = inlined_call_operand.hbm [shape: f32[2,16,128], index: 1, kind: input, shape index: {}]   ;;  %s4084_s2 = inlined_call_operand.vmem [shape: f32[8,8], index: 2, kind: input, shape index: {}]   ;;  %s4085_s3 = inlined_call_operand.vmem [shape: f32[8,16], index: 3, kind: input, shape index: {}]   ;;  %s4086_s4 = inlined_call_operand.vmem [shape: f32[6,128], index: 4, kind: input, shape index: {}]   ;;  %s4087_s5 = inlined_call_operand.hbm [shape: f32[2,384], index: 5, kind: input, shape index: {}]   ;;  %s4088_s6 = inlined_call_operand.vmem [shape: f32[3,128], index: 6, kind: input, shape index: {}]   ;;  %s4089_s7 = inlined_call_operand.hbm [shape: bf16[2,128,384], index: 7, kind: input, shape index: {}]   ;;  %s4090_s8 = inlined_call_operand.hbm [shape: bf16[2,128,128], index: 8, kind: input, shape index: {}]   ;;  %s4091_s9 = inlined_call_operand.hbm [shape: bf16[128,512], index: 9, kind: input, shape index: {}]   ;;  %s4092_s10 = inlined_call_operand.hbm [shape: f32[1,512], index: 10, kind: input, shape index: {}]   ;;  %s4093_s11 = inlined_call_operand.hbm [shape: bf16[512,128], index: 11, kind: input, shape index: {}]   ;;  %s4094_s12 = inlined_call_operand.hbm [shape: f32[2,8,128], index: 12, kind: output, shape index: {}]  }
   0x1   :  { %4096 = sst [smem:[#allocation20_spill]] %s4087_s5 }
   0x2   :  { %4097 = sst [smem:[#allocation21_spill]] %s4089_s7 }
   0x3   :  { %4098 = sst [smem:[#allocation22_spill]] %s4090_s8 }
   0x4   :  { %4099 = sst [smem:[#allocation23_spill]] %s4091_s9 }
   0x5   :  { %4100 = sst [smem:[#allocation24_spill]] %s4092_s10 }
   0x6   :  { %4101 = sst [smem:[#allocation25_spill]] %s4093_s11 }
   0x7   :  { %4102 = sst [smem:[#allocation26_spill]] %s4094_s12 }
   0x8   :  { %17 = vsyncpa [#allocation3], 0 }
   0x9   :  { %19 = vsyncpa [#allocation3 + $0x1], 0 }
   0xa   :  { %20 = vsyncpa [#allocation6], 0 }
   0xb   :  { %21 = vsyncpa [#allocation9], 0 }
   0xc   :  { %22 = vsyncpa [#allocation12], 0 }
   0xd   :  { %23 = vsyncpa [#allocation4], 0 }
   0xe   :  { %25 = vsyncpa [#allocation4 + $0x1], 0  ;;  %s3691_s21 = smov 0   ;;  %s3693_s22 = smov 0  }
   0xf   :  { %s3695_s23 = smov 0   ;;  %s3697_s24 = smov 0  }
  0x10 LB: > { %s4103_s5 = sld [smem:[#allocation20_spill]]  ;;  %s3715_s28 = sadd.s32 4294967295, %s3606_s24   ;;  %s3606_s24 = sphi %s3697_s24, %s4121_s24   ;;  %s3602_s23 = sphi %s3695_s23, %s4120_s23   ;;  %s3598_s22 = sphi %s3693_s22, %s4119_s22   ;;  %s3594_s21 = sphi %s3691_s21, %s4118_s21  }
  0x11   : > { %p2473_p0 = scmp.ge.s32.totalorder %s3606_s24, 1  ;;  %p78_p1 = scmp.eq.s32.totalorder %s3715_s28, 0 }
  0x12   : > { %p324_p2 = scmp.lt.s32.totalorder %s3606_s24, 3  ;;  %s3608_s30 = smov [#allocation5]  }
  0x13   : > { %s347_s13 = sshll.u32 %s3608_s30, 4  ;;  %s4105_s8 = sld [smem:[#allocation22_spill]]  ;;  %s348_s13 = int_to_ptr.vmem [resolvable:$true] %s347_s13 }
  0x14   : > { %p3720_p3 = pnand %p2473_p0, %p324_p2  ;;  %s3609_s18 = smov [#allocation8]  }
  0x15   : > { %s375_s19 = sshll.u32 %s3609_s18, 4  ;;  %s3610_s20 = smov 64   ;;  %s376_s19 = int_to_ptr.vmem [resolvable:$true] %s375_s19 }
  0x16   : > { %s345_s27 = sshll.u32 %s4103_s5, 4  ;;  %p3183_p5 = pneg %p3720_p3  ;;  %s346_s27 = int_to_ptr.hbm [resolvable:$true] %s345_s27 }
  0x17   : > { %s3611_s25 = smov 4   ;;  %s4107_s10 = sld [smem:[#allocation24_spill]] }
  0x18   : > { %p3732_p6 = pnand %p3183_p5, %p78_p1  ;;  %s3612_s15 = smov [#allocation11]  }
  0x19   : > { %s373_s16 = sshll.u32 %s4105_s8, 4  ;;  %s404_s5 = sshll.u32 %s3612_s15, 4  ;;  %s374_s16 = int_to_ptr.hbm [resolvable:$true] %s373_s16  ;;  %s405_s5 = int_to_ptr.vmem [resolvable:$true] %s404_s5 }
  0x1a   : > { %3186 = dma.hbm_to_vmem [thread:$0]  (!%p3732_p6), %s346_s27, 96, %s348_s13, [#allocation6]  }
  0x1b   : > { %3192 = dma.hbm_to_vmem [thread:$0]  (!%p3732_p6), %s374_s16, 2048, %s376_s19, [#allocation9], %s3610_s20, %s3610_s20, %s3611_s25  }
  0x1c   : > { %s4108_s7 = sld [smem:[#allocation21_spill]]  ;;  %s3613_s13 = smov [#allocation7]  }
  0x1d   : > { %s402_s14 = sshll.u32 %s4107_s10, 4  ;;  %s361_s12 = sshll.u32 %s3613_s13, 4  ;;  %s403_s14 = int_to_ptr.hbm [resolvable:$true] %s402_s14  ;;  %s362_s12 = int_to_ptr.vmem [resolvable:$true] %s361_s12 }
  0x1e   : > { %3198 = dma.hbm_to_vmem [thread:$0]  (!%p3732_p6), %s403_s14, 64, %s405_s5, [#allocation12]  }
  0x1f   : > { %s3614_s16 = smov 192   ;;  %s3615_s19 = smov 12  }
  0x20   : > { %s4109_s9 = sld [smem:[#allocation23_spill]]  ;;  %s3616_s5 = smov [#allocation10]  }
  0x21   : > { %s389_s8 = sshll.u32 %s3616_s5, 4  ;;  %s4110_s11 = sld [smem:[#allocation25_spill]]  ;;  %s390_s8 = int_to_ptr.vmem [resolvable:$true] %s389_s8 }
  0x22   : > { %s359_s27 = sshll.u32 %s4108_s7, 4  ;;  %s2472_s26 = sadd.s32 4294967294, %s3606_s24   ;;  %s360_s27 = int_to_ptr.hbm [resolvable:$true] %s359_s27 }
  0x23   : > { %3189 = dma.hbm_to_vmem [thread:$0]  (!%p3732_p6), %s360_s27, 6144, %s362_s12, [#allocation6], %s3614_s16, %s3614_s16, %s3615_s19  }
  0x24   : > { %s3617_s12 = smov 256   ;;  %s3618_s27 = smov 16  }
  0x25   : > { %s3619_s16 = smov [#allocation13]   ;;  %s3768_s30 = sadd.s32 1, %s3606_s24  }
  0x26   : > { %s387_s15 = sshll.u32 %s4109_s9, 4  ;;  %s415_s19 = sshll.u32 %s3619_s16, 4  ;;  %s388_s15 = int_to_ptr.hbm [resolvable:$true] %s387_s15  ;;  %s416_s19 = int_to_ptr.vmem [resolvable:$true] %s415_s19 }
  0x27   : > { %s413_s13 = sshll.u32 %s4110_s11, 4  ;;  %s61_s5 = ssub.s32 %s3606_s24, %s3768_s30  ;;  %s414_s13 = int_to_ptr.hbm [resolvable:$true] %s413_s13 }
  0x28   : > { %3195 = dma.hbm_to_vmem [thread:$0]  (!%p3732_p6), %s388_s15, 4096, %s390_s8, [#allocation9], %s3617_s12, %s3617_s12, %s3618_s27  }
  0x29   : > { %3201 = dma.hbm_to_vmem [thread:$0]  (!%p3732_p6), %s414_s13, 4096, %s416_s19, [#allocation12], %s3610_s20, %s3610_s20, %s3611_s25  }
  0x2a   : > { %s64_s15 = sadd.s32 1, %s3602_s23  ;;  %p62_p7 = scmp.eq.s32.totalorder %s61_s5, 0 }
  0x2b   : > { %p71_p8 = scmp.ne.s32.totalorder %s3602_s23, %s3598_s22  ;;  %p72_p9 = scmp.eq.s32.totalorder %s3606_s24, 0 }
  0x2c   : > { %p77_p10 = scmp.ne.s32.totalorder %s3598_s22, %s3594_s21  ;;  %p311_p13 = scmp.eq.s32.totalorder %s3715_s28, 1 }
  0x2d   : > { %s3779_s8 = scalar_select %p62_p7, %s3602_s23, %s64_s15  }
  0x2e   : > { %p3781_p11 = por %p72_p9, %p71_p8  ;;  %p3787_p12 = por %p78_p1, %p77_p10 }
  0x2f   : > { %p317_p0 = scmp.eq.s32.totalorder %s2472_s26, 1  ;;  %p3216_p2 = scmp.lt.s32.totalorder %s3606_s24, 2 }
  0x30   : > { %s436_s25 = sand.u32 1, %s3602_s23   ;;  %p3794_p5 = por %p311_p13, %p71_p8 }
  0x31   : > { %p3798_p6 = por %p317_p0, %p77_p10  ;;  %s2481_s13 = sshll.u32 %s436_s25, 4 }
  0x32   : > { %s3026_s12 = sshll.u32 %s3606_s24, 4  ;;  %s440_s5 = scalar_lea.vmem [#allocation2], %s2481_s13 }
  0x33   : > { %s445_s19 = scalar_lea.hbm %s4083_s1, %s3026_s12  ;;  %s448_s15 = sshll.u32 %s440_s5, 4  ;;  %s449_s15 = int_to_ptr.vmem [resolvable:$true] %s448_s15 }
  0x34   : > { %s446_s7 = sshll.u32 %s445_s19, 4  ;;  %p3808_p7 = pnand %p3216_p2, %p3781_p11  ;;  %s447_s7 = int_to_ptr.hbm [resolvable:$true] %s446_s7 }
  0x35   : > { %s437_s9 = scalar_lea.sflag [#allocation3], %s436_s25  ;;  %s3498_s10 = sshra.s32 %s447_s7, 4  ;;  %s3499_s10 = int_to_ptr.hbm [resolvable:$true] %s3498_s10 }
  0x36   : > { %s3500_s11 = scalar_lea.hbm %s3499_s10, 16  ;;  %p3502_p9 = pneg %p3808_p7 }
  0x37   : > { %p3501_p8 = scmp.ne.s32.totalorder %s3499_s10, %s3500_s11  ;;  %s3505_s27 = scalar_lea.hbm %s4083_s1, 32 }
  0x38   : > { %p3506_p11 = scmp.lt.s32.totalorder %s3499_s10, %s4083_s1  ;;  %p3507_p0 = scmp.lt.s32.totalorder %s3505_s27, %s3500_s11 }
  0x39   : > { %p3503_p10 = pnand %p3502_p9, %p3501_p8 }
  0x3a   : > { %p3508_p2 = por %p3507_p0, %p3506_p11 }
  0x3b   : > { %p3504_p13 = pneg %p3503_p10 }
  0x3d   : > { %p3509_p4 = pnand %p3508_p2, %p3504_p13 }
  0x3f   : > { %3512 = shalt.err (!%p3509_p4)
}
  0x40   : > { %s3620_s25 = smov 128   ;;  %s3621_s19 = smov 8  }
  0x41   : > { %3205 = dma.hbm_to_vmem [thread:$0]  (!%p3808_p7), %s447_s7, 256, %s449_s15, %s437_s9, %s3620_s25, %s3620_s25, %s3621_s19  }
  0x42   : > { %460 = sbr.rel (%p3720_p3) target bundleno = 2887 (0xb47), region = 68  ;;  %s3825_s5 = sand.u32 (!%p3720_p3), 1, %s3598_s22  }
  0x43   : > { %s2485_s13 = sshll.u32 (!%p3720_p3), %s3825_s5, 4  ;;  %s463_s10 = scalar_lea.sflag (!%p3720_p3), [#allocation3], %s3825_s5 }
  0x44   : > { %s3829_s11 = scalar_lea.vmem (!%p3720_p3), [#allocation2], %s2485_s13 }
  0x47   : > { %3573 = dma.done.wait (%p3787_p12), %s463_s10, 256  }
  0x48   : > { %3575 = vsyncadd (%p3787_p12), %s463_s10, 4294967040 }
  0x49   : > { %3577 = dma.done.wait (%p78_p1), [#allocation6], 6240  }
  0x4a   : > { %3579 = vsyncadd (%p78_p1), [#allocation6], 4294961056 }
  0x4b   : > { %3581 = dma.done.wait (%p78_p1), [#allocation9], 6144  }
  0x4c   : > { %3583 = vsyncadd (%p78_p1), [#allocation9], 4294961152 }
  0x4d   : > { %3585 = dma.done.wait (%p78_p1), [#allocation12], 4160  }
  0x4e   : > { %3587 = vsyncadd (%p78_p1), [#allocation12], 4294963136  ;;  %p542_p3 = scmp.lt.s32.totalorder %s3715_s28, 1  ;;  %v3622_v2 = vmov 128.0   ;;  %v2580_v3 = vld [vmem:[#allocation7 + $0xa8] sm:$0xf] }
  0x4f   : > { %3277 = vrcp.f32 %v3622_v2  ;;  %v3049_v4 = vld [vmem:[#allocation7 + $0xb0] sm:$0xf0]  ;;  %v3048_v5 = vld [vmem:[#allocation7 + $0xac] sm:$0xf]  ;;  %v2582_v7 = vld [vmem:[#allocation7 + $0xb4] sm:$0xf0] }
  0x50   : > { %s543_s7 = scalar_select %p542_p3, %s3715_s28, 1  ;;  %v2581_v6 = vor.u32 %v3049_v4, %v2580_v3  ;;  %v2588_v8 = vld [vmem:[#allocation7 + $0xb0] sm:$0xf]  ;;  %v3050_v9 = vld [vmem:[#allocation7 + $0xb8] sm:$0xf0]  ;;  %v2585_v10 = vor.u32 %v3048_v5, %v2582_v7  ;;  %vm835_vm4 = vcmask 261120  }
  0x51   : > { %v2589_v11 = vor.u32 %v3050_v9, %v2588_v8  ;;  %v2568_v13 = vld [vmem:[#allocation7 + $0x90] sm:$0xf]  ;;  %v3046_v14 = vld [vmem:[#allocation7 + $0x98] sm:$0xf0]  ;;  %v3045_v15 = vld [vmem:[#allocation7 + $0x94] sm:$0xf] }
  0x52   : > { %s2493_s9 = sshll.u32 %s543_s7, 3  ;;  %772 = vmatpush.bf16.msra.mxu0 %v2581_v6  ;;  %785 = vmatpush.bf16.msra.mxu1 %v2585_v10  ;;  %v2569_v16 = vor.u32 %v3046_v14, %v2568_v13  ;;  %v2570_v17 = vld [vmem:[#allocation7 + $0x9c] sm:$0xf0]  ;;  %v2576_v18 = vld [vmem:[#allocation7 + $0x98] sm:$0xf]  ;;  %s3623_s27 = smov 32  }
  0x53   : > { %s545_s15 = scalar_lea.vmem %s4082_s0, %s2493_s9  ;;  %798 = vmatpush.bf16.msra.mxu2 %v2589_v11  ;;  %v3047_v19 = vld [vmem:[#allocation7 + $0xa0] sm:$0xf0]  ;;  %v2573_v20 = vor.u32 %v3045_v15, %v2570_v17  ;;  %v2556_v23 = vld [vmem:[#allocation7 + $0x78] sm:$0xf]  ;;  %v3042_v25 = vld [vmem:[#allocation7 + $0x7c] sm:$0xf] }
  0x54   : > { %v3852_v0 = vld [vmem:[%s545_s15] sm:$0xff]  ;;  %v2577_v21 = vor.u32 %v3047_v19, %v2576_v18  ;;  %v3043_v24 = vld [vmem:[#allocation7 + $0x80] sm:$0xf0]  ;;  %v2558_v27 = vld [vmem:[#allocation7 + $0x84] sm:$0xf0]  ;;  %s3624_s16 = smov 64  }
  0x55   : > { %551 = vadd.xlane.f32.xlu0 %v3852_v0  ;;  %v561_v1 = vmul.f32 %v3852_v0, %v3852_v0  ;;  %v3857_v12 = vpop.eup %3277  ;;  %v2557_v26 = vor.u32 %v3043_v24, %v2556_v23  ;;  %v2564_v28 = vld [vmem:[#allocation7 + $0x80] sm:$0xf]  ;;  %v3044_v29 = vld [vmem:[#allocation7 + $0x88] sm:$0xf0]  ;;  %v2561_v30 = vor.u32 %v3042_v25, %v2558_v27  ;;  %v3039_v35 = vld [vmem:[#allocation7 + $0x64] sm:$0xf] }
  0x56   : > { %v554_v22 = vmul.f32 128.0, %v3857_v12  ;;  %773 = vmatpush.bf16.msra.mxu0 %v2569_v16  ;;  %786 = vmatpush.bf16.msra.mxu1 %v2573_v20  ;;  %v2565_v31 = vor.u32 %v3044_v29, %v2564_v28  ;;  %v2544_v33 = vld [vmem:[#allocation7 + $0x60] sm:$0xf]  ;;  %v3040_v34 = vld [vmem:[#allocation7 + $0x68] sm:$0xf0]  ;;  %vm558_vm0 = vweird.f32 %v3857_v12  ;;  %s3625_s17 = smov 96  }
  0x57   : > { %799 = vmatpush.bf16.msra.mxu2 %v2577_v21  ;;  %v2545_v36 = vor.u32 %v3040_v34, %v2544_v33  ;;  %v2546_v37 = vld [vmem:[#allocation7 + $0x6c] sm:$0xf0]  ;;  %v2552_v38 = vld [vmem:[#allocation7 + $0x68] sm:$0xf]  ;;  %v3041_v39 = vld [vmem:[#allocation7 + $0x70] sm:$0xf0] }
  0x58   : > { %v555_v32 = vsub.f32 1.0, %v554_v22  ;;  %v2549_v40 = vor.u32 %v3039_v35, %v2546_v37  ;;  %v2553_v41 = vor.u32 %v3041_v39, %v2552_v38  ;;  %v2532_v42 = vld [vmem:[#allocation7 + $0x48] sm:$0xf]  ;;  %v3037_v43 = vld [vmem:[#allocation7 + $0x50] sm:$0xf0]  ;;  %vm964_vm5 = vcmask 1043456  }
  0x59   : > { %v3036_v44 = vld [vmem:[#allocation7 + $0x4c] sm:$0xf]  ;;  %v2533_v46 = vor.u32 %v3037_v43, %v2532_v42  ;;  %v2534_v47 = vld [vmem:[#allocation7 + $0x54] sm:$0xf0]  ;;  %v2540_v48 = vld [vmem:[#allocation7 + $0x50] sm:$0xf] }
  0x5a   : > { %774 = vmatpush.bf16.msra.mxu0 %v2557_v26  ;;  %787 = vmatpush.bf16.msra.mxu1 %v2561_v30  ;;  %v556_v45 = vmul.f32 %v3857_v12, %v555_v32  ;;  %v3038_v49 = vld [vmem:[#allocation7 + $0x58] sm:$0xf0]  ;;  %v2537_v50 = vor.u32 %v3036_v44, %v2534_v47  ;;  %v2520_v52 = vld [vmem:[#allocation7 + $0x30] sm:$0xf]  ;;  %v3033_v54 = vld [vmem:[#allocation7 + $0x34] sm:$0xf] }
  0x5b   : > { %800 = vmatpush.bf16.msra.mxu2 %v2565_v31  ;;  %v2541_v51 = vor.u32 %v3038_v49, %v2540_v48  ;;  %v3034_v53 = vld [vmem:[#allocation7 + $0x38] sm:$0xf0]  ;;  %v2522_v57 = vld [vmem:[#allocation7 + $0x3c] sm:$0xf0]  ;;  %v2528_v58 = vld [vmem:[#allocation7 + $0x38] sm:$0xf] }
  0x5c   : > { %v557_v55 = vadd.f32 %v3857_v12, %v556_v45  ;;  %v2521_v56 = vor.u32 %v3034_v53, %v2520_v52  ;;  %v3035_v59 = vld [vmem:[#allocation7 + $0x40] sm:$0xf0]  ;;  %v2525_v60 = vor.u32 %v3033_v54, %v2522_v57  ;;  %v2508_v63 = vld [vmem:[#allocation7 + $0x18] sm:$0xf]  ;;  %v3030_v2 = vld [vmem:[#allocation7 + $0x1c] sm:$0xf] }
  0x5d   : > { %562 = vadd.xlane.f32.xlu0 %v561_v1  ;;  %v2529_v61 = vor.u32 %v3035_v59, %v2528_v58  ;;  %v3031_v1 = vld [vmem:[#allocation7 + $0x20] sm:$0xf0]  ;;  %v2510_v4 = vld [vmem:[#allocation7 + $0x24] sm:$0xf0]  ;;  %v2516_v5 = vld [vmem:[#allocation7 + $0x20] sm:$0xf] }
  0x5e   : > { %775 = vmatpush.bf16.msra.mxu0 %v2545_v36  ;;  %788 = vmatpush.bf16.msra.mxu1 %v2549_v40  ;;  %v2509_v3 = vor.u32 %v3031_v1, %v2508_v63  ;;  %v3032_v6 = vld [vmem:[#allocation7 + $0x28] sm:$0xf0]  ;;  %v3864_v7 = vsel %vm558_vm0, %v3857_v12, %v557_v55  ;;  %v2513_v8 = vor.u32 %v3030_v2, %v2510_v4  ;;  %v2496_v10 = vld [vmem:[#allocation7] sm:$0xf]  ;;  %v3027_v13 = vld [vmem:[#allocation7 + $0x4] sm:$0xf] }
  0x5f   : > { %801 = vmatpush.bf16.msra.mxu2 %v2553_v41  ;;  %v2517_v9 = vor.u32 %v3032_v6, %v2516_v5  ;;  %v3028_v11 = vld [vmem:[#allocation7 + $0x8] sm:$0xf0]  ;;  %v2498_v14 = vld [vmem:[#allocation7 + $0xc] sm:$0xf0]  ;;  %v2504_v15 = vld [vmem:[#allocation7 + $0x8] sm:$0xf] }
  0x60   : > { %v3029_v16 = vld [vmem:[#allocation7 + $0x10] sm:$0xf0]  ;;  %v2497_v17 = vor.u32 %v3028_v11, %v2496_v10  ;;  %v2501_v19 = vor.u32 %v3027_v13, %v2498_v14  ;;  %v3871_v31 = vld [vmem:[%s4086_s4] sm:$0x3f]  ;;  %vm912_vm6 = vcmask 64512   ;;  %vm1051_vm7 = vcmask 523264  }
  0x61   : > { %v2505_v20 = vor.u32 %v3029_v16, %v2504_v15  ;;  %v581_v34 = vperm.slane %v3871_v31, 0  ;;  %v583_v37 = vperm.slane %v3871_v31, 1  ;;  %v617_v41 = vld [vmem:[#allocation5] ss:$2 sm:$0x7]  ;;  %vm1053_vm8 = vcmask 785408  }
  0x62   : > { %776 = vmatpush.bf16.msra.mxu0 %v2533_v46  ;;  %789 = vmatpush.bf16.msra.mxu1 %v2537_v50  ;;  %v639_v42 = vperm.slane %v617_v41, 1  ;;  %v638_v45 = vperm.slane %v617_v41, 0  ;;  %v640_v47 = vperm.slane %v617_v41, 2  ;;  %vm1507_vm12 = vcmask 130048   ;;  %s4116_s19 = sld [smem:[#allocation26_spill]] }
  0x63   : > { %802 = vmatpush.bf16.msra.mxu2 %v2541_v51 }
  0x66   : > { %777 = vmatpush.bf16.msra.mxu0 %v2521_v56  ;;  %790 = vmatpush.bf16.msra.mxu1 %v2525_v60 }
  0x67   : > { %803 = vmatpush.bf16.msra.mxu2 %v2529_v61 }
  0x68   : > { %s3548_s26 = scalar_lea.hbm %s4116_s19, 16 }
  0x6a   : > { %778 = vmatpush.bf16.msra.mxu0 %v2509_v3  ;;  %791 = vmatpush.bf16.msra.mxu1 %v2513_v8  ;;  %v635_v3 = vld [vmem:[%s4084_s2] sm:$0xff] }
  0x6b   : > { %804 = vmatpush.bf16.msra.mxu2 %v2517_v9 }
  0x6e   : > { %779 = vmatpush.bf16.msra.mxu0 %v2497_v17  ;;  %792 = vmatpush.bf16.msra.mxu1 %v2501_v19 }
  0x6f   : > { %805 = vmatpush.bf16.msra.mxu2 %v2505_v20 }
  0xc8   : > { %v552_v62 = vpop.xlane.xlu0 %551 }
  0xc9   : > { %v560_v18 = vmul.f32 %v3864_v7, %v552_v62 }
  0xcb   : > { %v565_v12 = vmul.f32 %v560_v18, %v560_v18  ;;  %v568_v33 = vsub.f32 %v3852_v0, %v560_v18 }
  0xd0   : > { %v563_v21 = vpop.xlane.xlu0 %562 }
  0xd1   : > { %v564_v22 = vmul.f32 %v563_v21, %v3864_v7 }
  0xd3   : > { %v566_v23 = vsub.f32 %v564_v22, %v565_v12 }
  0xd5   : > { %v567_v24 = vmax.f32 %v566_v23, 0.0 }
  0xd7   : > { %v569_v25 = vadd.f32 1e-12, %v567_v24 }
  0xd9   : > { %3279 = vrsqrt.f32 %v569_v25  ;;  %vm576_vm2 = vweird.f32 %v569_v25 }
  0xdf   : > { %v3280_v26 = vpop.eup %3279 }
  0xe0   : > { %v571_v27 = vmul.f32 %v3280_v26, %v569_v25  ;;  %vm577_vm1 = vweird.f32 %v3280_v26 }
  0xe1   : > { %vm578_vm3 = vmor %vm576_vm2, %vm577_vm1 }
  0xe2   : > { %v572_v28 = vmul.f32 %v3280_v26, %v571_v27 }
  0xe4   : > { %v573_v29 = vmul.f32 0.5, %v572_v28 }
  0xe6   : > { %v574_v30 = vsub.f32 1.5, %v573_v29 }
  0xe8   : > { %v575_v32 = vmul.f32 %v3280_v26, %v574_v30 }
  0xea   : > { %v579_v35 = vsel %vm578_vm3, %v3280_v26, %v575_v32 }
  0xeb   : > { %v580_v36 = vmul.f32 %v579_v35, %v568_v33 }
  0xed   : > { %v582_v38 = vmul.f32 %v581_v34, %v580_v36 }
  0xef   : > { %v3876_v39 = vadd.f32 %v583_v37, %v582_v38 }
  0xf1   : > { %v636_v40 = vpack.c.bf16 %v3876_v39, %v3876_v39 }
  0xf3   : > { %780 = vmatmul.bf16.vlgmr.msra.gmra.mxu0 %v636_v40  ;;  %793 = vmatmul.bf16.vlgmr.msra.gmra.mxu1 %v636_v40 }
  0xf4   : > { %806 = vmatmul.bf16.vlgmr.msra.gmra.mxu2 %v636_v40 }
 0x170   : > { %v781_v43 = vpop.f32.mrf.mxu0  ;;  %v794_v0 = vpop.f32.mrf.mxu1 }
 0x171   : > { %v795_v44 = vadd.f32 %v794_v0, %v639_v42  ;;  %v782_v49 = vadd.f32 %v781_v43, %v638_v45 }
 0x173   : > { %v819_v46 = vpack.c.bf16 %v795_v44, %v795_v44  ;;  %v811_v55 = vpack.c.bf16 %v782_v49, %v782_v49 }
 0x175   : > { %825 = vrot.lane.b32.xlu0 %v819_v46, %s3623_s27  ;;  %823 = vrot.lane.b32.xlu2 %v819_v46, %s3624_s16  ;;  %v840_v48 = vsel %vm835_vm4, %v819_v46, 0 }
 0x176   : > { %821 = vrot.lane.b32.xlu1 %v819_v46, %s3625_s17  ;;  %849 = vmatpush.bf16.xpose.msra.mxu3 %v840_v48 }
 0x177   : > { %v807_v50 = vpop.f32.mrf.mxu2 }
 0x178   : > { %v808_v51 = vadd.f32 %v807_v50, %v640_v47  ;;  %v783_v52 = vpop.f32.mrf.mxu0  ;;  %v796_v53 = vpop.f32.mrf.mxu1 }
 0x17a   : > { %v3884_v54 = vpack.c.bf16 %v808_v51, %v808_v51 }
 0x17c   : > { %v966_v56 = vsel %vm964_vm5, %v3884_v54, 0 }
 0x17d   : > { %975 = vmatpush.bf16.msrb.mxu2 %v966_v56  ;;  %815 = vrot.lane.b32.xlu2 %v811_v55, %s3624_s16 }
 0x17e   : > { %813 = vrot.lane.b32.xlu1 %v811_v55, %s3625_s17  ;;  %2590 = vmatmul.msk.bf16.vlgmr.msra.gmra.mxu3 %vm835_vm4, %v811_v55 }
 0x17f   : > { %v809_v57 = vpop.f32.mrf.mxu2 }
 0x186   : > { %817 = vrot.lane.b32.xlu1 %v811_v55, %s3623_s27 }
 0x1cf   : > { %v824_v58 = vpop.permute.xlu2 %823 }
 0x1d0   : > { %v878_v63 = vsel %vm835_vm4, %v824_v58, 0 }
 0x1d7   : > { %v816_v4 = vpop.permute.xlu2 %815 }
 0x1e7   : > { %v826_v59 = vpop.permute.xlu0 %825 }
 0x1e8   : > { %v822_v60 = vpop.permute.xlu1 %821  ;;  %v897_v61 = vsel %vm835_vm4, %v826_v59, 0 }
 0x1e9   : > { %v859_v62 = vsel %vm835_vm4, %v822_v60, 0  ;;  %906 = vmatpush.bf16.xpose.msrb.mxu0 %v897_v61 }
 0x1ea   : > { %868 = vmatpush.bf16.xpose.msrb.mxu3 %v859_v62 }
 0x1f0   : > { %v814_v1 = vpop.permute.xlu1 %813 }
 0x1f1   : > { %2591 = vmatmul.msk.bf16.vlgmr.msrb.gmra.mxu3 %vm835_vm4, %v814_v1 }
 0x1f2   : > { %887 = vmatpush.bf16.xpose.msra.mxu3 %v878_v63 }
 0x1f8   : > { %v818_v2 = vpop.permute.xlu1 %817 }
 0x1f9   : > { %2593 = vmatmul.msk.bf16.vlgmr.msrb.gmra.mxu0 %vm835_vm4, %v818_v2 }
 0x201   : > { %v851_v5 = vpop.f32.mrf.mxu3  ;;  %2592 = vmatmul.msk.bf16.vlgmr.msra.gmra.mxu3 %vm835_vm4, %v816_v4  ;;  %v3058_v4 = vld [vmem:[#allocation8 + $0x38] sm:$0xff] }
 0x202   : > { %v852_v6 = vadd.f32 %v851_v5, %v635_v3  ;;  %1105 = vmatpush.bf16.msrb.mxu1 %v3058_v4 }
 0x204   : > { %v913_v8 = vsel %vm912_vm6, %v852_v6, -inf }
 0x205   : > { %914 = vmax.xlane.f32.xlu2 %v913_v8 }
 0x209   : > { %v853_v9 = vpop.f32.mrf.mxu3 }
 0x274   : > { %v870_v10 = vpop.f32.mrf.mxu3 }
 0x275   : > { %v871_v11 = vadd.f32 %v870_v10, %v635_v3 }
 0x276   : > { %v908_v13 = vpop.f32.mrf.mxu0 }
 0x277   : > { %v909_v14 = vadd.f32 %v908_v13, %v635_v3  ;;  %v916_v15 = vsel %vm912_vm6, %v871_v11, -inf  ;;  %v3057_v13 = vld [vmem:[#allocation8 + $0x30] sm:$0xff] }
 0x278   : > { %917 = vmax.xlane.f32.xlu1 %v916_v15  ;;  %v915_v16 = vpop.xlane.xlu2 %914  ;;  %1106 = vmatpush.bf16.msrb.mxu1 %v3057_v13  ;;  %v3055_v15 = vld [vmem:[#allocation8 + $0x20] sm:$0xff]  ;;  %v2640_v13 = vld [vmem:[#allocation7 + $0xf0] sm:$0xf] }
 0x279   : > { %v925_v17 = vsub.f32 %v852_v6, %v915_v16  ;;  %v922_v18 = vsel %vm912_vm6, %v909_v14, -inf  ;;  %v3054_v16 = vld [vmem:[#allocation8 + $0x18] sm:$0xff] }
 0x27a   : > { %923 = vmax.xlane.f32.xlu2 %v922_v18  ;;  %v3052_v18 = vld [vmem:[#allocation8 + $0x8] sm:$0xff] }
 0x27b   : > { %v929_v19 = vmul.f32 1.442695, %v925_v17  ;;  %v3053_v17 = vld [vmem:[#allocation8 + $0x10] sm:$0xff] }
 0x27c   : > { %v872_v20 = vpop.f32.mrf.mxu3 }
 0x27d   : > { %3281 = vpow2.f32 %v929_v19  ;;  %v3051_v19 = vld [vmem:[#allocation8] sm:$0xff] }
 0x27e   : > { %v910_v21 = vpop.f32.mrf.mxu0 }
 0x283   : > { %v3282_v12 = vpop.eup %3281 }
 0x284   : > { %v889_v22 = vpop.f32.mrf.mxu3  ;;  %v937_v23 = vsel %vm912_vm6, %v3282_v12, 0.0 }
 0x285   : > { %v890_v24 = vadd.f32 %v889_v22, %v635_v3  ;;  %938 = vadd.xlane.f32.xlu2 %v937_v23 }
 0x287   : > { %v919_v25 = vsel %vm912_vm6, %v890_v24, -inf }
 0x288   : > { %920 = vmax.xlane.f32.xlu0 %v919_v25 }
 0x28c   : > { %v891_v26 = vpop.f32.mrf.mxu3 }
 0x28d   : > { %v3080_v26 = vld [vmem:[#allocation7 + $0x16c] sm:$0xf] }
 0x2eb   : > { %v918_v27 = vpop.xlane.xlu1 %917 }
 0x2ec   : > { %v926_v28 = vsub.f32 %v871_v11, %v918_v27  ;;  %v2718_v27 = vld [vmem:[#allocation7 + $0x174] sm:$0xf0] }
 0x2ed   : > { %v924_v29 = vpop.xlane.xlu2 %923 }
 0x2ee   : > { %v931_v30 = vmul.f32 1.442695, %v926_v28  ;;  %v928_v32 = vsub.f32 %v909_v14, %v924_v29  ;;  %v3056_v14 = vld [vmem:[#allocation8 + $0x28] sm:$0xff]  ;;  %v3077_v28 = vld [vmem:[#allocation7 + $0x154] sm:$0xf]  ;;  %v2721_v29 = vor.u32 %v3080_v26, %v2718_v27 }
 0x2ef   : > { %1107 = vmatpush.bf16.msrb.mxu1 %v3056_v14  ;;  %v3066_v14 = vld [vmem:[#allocation7 + $0xf8] sm:$0xf0]  ;;  %v2724_v27 = vld [vmem:[#allocation7 + $0x170] sm:$0xf] }
 0x2f0   : > { %3283 = vpow2.f32 %v931_v30  ;;  %v935_v33 = vmul.f32 1.442695, %v928_v32  ;;  %v2710_v30 = vld [vmem:[#allocation7 + $0x15c] sm:$0xf0] }
 0x2f1   : > { %v2713_v32 = vor.u32 %v3077_v28, %v2710_v30  ;;  %v3082_v28 = vld [vmem:[#allocation7 + $0x178] sm:$0xf0] }
 0x2f2   : > { %3285 = vpow2.f32 %v935_v33  ;;  %v3074_v33 = vld [vmem:[#allocation7 + $0x13c] sm:$0xf]  ;;  %v2725_v30 = vor.u32 %v3082_v28, %v2724_v27 }
 0x2f3   : > { %1108 = vmatpush.bf16.msrb.mxu1 %v3055_v15  ;;  %v2641_v15 = vor.u32 %v3066_v14, %v2640_v13 }
 0x2f6   : > { %v3284_v34 = vpop.eup %3283 }
 0x2f7   : > { %v940_v35 = vsel %vm912_vm6, %v3284_v34, 0.0  ;;  %1109 = vmatpush.bf16.msrb.mxu1 %v3054_v16  ;;  %v2636_v16 = vld [vmem:[#allocation7 + $0xd8] sm:$0xf] }
 0x2f8   : > { %v3286_v36 = vpop.eup %3285  ;;  %941 = vadd.xlane.f32.xlu1 %v940_v35  ;;  %v939_v37 = vpop.xlane.xlu2 %938 }
 0x2f9   : > { %3287 = vrcp.f32 %v939_v37  ;;  %v946_v38 = vsel %vm912_vm6, %v3286_v36, 0.0  ;;  %v2694_v37 = vld [vmem:[#allocation7 + $0x12c] sm:$0xf0] }
 0x2fa   : > { %947 = vadd.xlane.f32.xlu0 %v946_v38 }
 0x2fb   : > { %v921_v40 = vpop.xlane.xlu0 %920  ;;  %1110 = vmatpush.bf16.msrb.mxu1 %v3053_v17  ;;  %v3063_v17 = vld [vmem:[#allocation7 + $0xe0] sm:$0xf0] }
 0x2fc   : > { %v927_v41 = vsub.f32 %v890_v24, %v921_v40  ;;  %v3068_v40 = vld [vmem:[#allocation7 + $0x10c] sm:$0xf] }
 0x2fe   : > { %v933_v42 = vmul.f32 1.442695, %v927_v41  ;;  %v2686_v41 = vld [vmem:[#allocation7 + $0x114] sm:$0xf0] }
 0x2ff   : > { %v3288_v43 = vpop.eup %3287  ;;  %1111 = vmatpush.bf16.msrb.mxu1 %v3052_v18  ;;  %v2637_v18 = vor.u32 %v3063_v17, %v2636_v16 }
 0x300   : > { %v953_v0 = vmul.f32 %v3288_v43, %v3282_v12  ;;  %3289 = vpow2.f32 %v933_v42  ;;  %v2689_v42 = vor.u32 %v3068_v40, %v2686_v41  ;;  %v3065_v43 = vld [vmem:[#allocation7 + $0xf4] sm:$0xf]  ;;  %v2700_v41 = vld [vmem:[#allocation7 + $0x128] sm:$0xf] }
 0x302   : > { %v957_v44 = vpack.c.bf16 %v953_v0, %v953_v0  ;;  %v2678_v0 = vld [vmem:[#allocation7 + $0xfc] sm:$0xf0] }
 0x303   : > { %1112 = vmatpush.bf16.msrb.mxu1 %v3051_v19  ;;  %v2632_v19 = vld [vmem:[#allocation7 + $0xc0] sm:$0xf] }
 0x304   : > { %2594 = vmatmul.msk.bf16.vlgmr.msrb.gmra.mxu2 %vm912_vm6, %v957_v44  ;;  %v2681_v44 = vor.u32 %v3065_v43, %v2678_v0 }
 0x306   : > { %v3290_v45 = vpop.eup %3289 }
 0x307   : > { %v943_v46 = vsel %vm912_vm6, %v3290_v45, 0.0 }
 0x308   : > { %944 = vadd.xlane.f32.xlu2 %v943_v46  ;;  %v2670_v46 = vld [vmem:[#allocation7 + $0xe4] sm:$0xf0] }
 0x30e   : > { %833 = vrot.lane.b32.xlu0 %v3884_v54, %s3623_s27 }
 0x311   : > { %829 = vrot.lane.b32.xlu1 %v3884_v54, %s3625_s17 }
 0x320   : > { %831 = vrot.lane.b32.xlu2 %v3884_v54, %s3624_s16 }
 0x36b   : > { %v942_v48 = vpop.xlane.xlu1 %941 }
 0x36d   : > { %v948_v47 = vpop.xlane.xlu0 %947 }
 0x36e   : > { %3291 = vrcp.f32 %v948_v47  ;;  %v3274_v47 = vld [vmem:[%s4088_s6] ss:$0 sm:$0xff] }
 0x36f   : > { %3293 = vrcp.f32 %v942_v48 }
 0x374   : > { %v3292_v50 = vpop.eup %3291 }
 0x375   : > { %v3294_v51 = vpop.eup %3293  ;;  %v956_v52 = vmul.f32 %v3292_v50, %v3286_v36  ;;  %v3071_v36 = vld [vmem:[#allocation7 + $0x124] sm:$0xf] }
 0x376   : > { %v954_v57 = vmul.f32 %v3294_v51, %v3284_v34  ;;  %v2702_v34 = vld [vmem:[#allocation7 + $0x144] sm:$0xf0]  ;;  %v2697_v38 = vor.u32 %v3071_v36, %v2694_v37  ;;  %v3059_v50 = vld [vmem:[#allocation7 + $0xc4] sm:$0xf]  ;;  %v2662_v51 = vld [vmem:[#allocation7 + $0xcc] sm:$0xf0] }
 0x377   : > { %v960_v61 = vpack.c.bf16 %v956_v52, %v956_v52  ;;  %v2705_v35 = vor.u32 %v3074_v33, %v2702_v34  ;;  %v2708_v36 = vld [vmem:[#allocation7 + $0x140] sm:$0xf]  ;;  %v3076_v37 = vld [vmem:[#allocation7 + $0x148] sm:$0xf0] }
 0x378   : > { %v958_v1 = vpack.c.bf16 %v954_v57, %v954_v57  ;;  %v549_v57 = vld [vmem:[%s3829_s11 + $0x8] sm:$0xff]  ;;  %v2709_v40 = vor.u32 %v3076_v37, %v2708_v36 }
 0x37b   : > { %v945_v49 = vpop.xlane.xlu2 %944 }
 0x37c   : > { %3295 = vrcp.f32 %v945_v49 }
 0x380   : > { %v834_v53 = vpop.permute.xlu0 %833 }
 0x381   : > { %v1023_v55 = vsel %vm964_vm5, %v834_v53, 0 }
 0x382   : > { %v3296_v56 = vpop.eup %3295  ;;  %1032 = vmatpush.bf16.msra.mxu0 %v1023_v55  ;;  %v2665_v55 = vor.u32 %v3059_v50, %v2662_v51 }
 0x383   : > { %v955_v58 = vmul.f32 %v3296_v56, %v3290_v45  ;;  %v830_v59 = vpop.permute.xlu1 %829  ;;  %v832_v60 = vpop.permute.xlu2 %831  ;;  %v3062_v45 = vld [vmem:[#allocation7 + $0xdc] sm:$0xf] }
 0x384   : > { %v985_v54 = vsel %vm964_vm5, %v830_v59, 0  ;;  %v1004_v62 = vsel %vm964_vm5, %v832_v60, 0  ;;  %v2673_v48 = vor.u32 %v3062_v45, %v2670_v46  ;;  %v548_v56 = vld [vmem:[%s3829_s11] sm:$0xff] }
 0x385   : > { %v959_v63 = vpack.c.bf16 %v955_v58, %v955_v58  ;;  %994 = vmatpush.bf16.msra.mxu2 %v985_v54  ;;  %1013 = vmatpush.bf16.msrb.mxu3 %v1004_v62  ;;  %v3939_v59 = vpack.c.bf16 %v549_v57, %v548_v56  ;;  %v3081_v54 = vld [vmem:[#allocation7 + $0x170] sm:$0xf0]  ;;  %v2656_v62 = vld [vmem:[#allocation7 + $0x150] sm:$0xf]  ;;  %v3070_v46 = vld [vmem:[#allocation7 + $0x118] sm:$0xf0] }
 0x386   : > { %2597 = vmatmul.msk.bf16.vlgmr.msra.gmra.mxu0 %vm912_vm6, %v960_v61  ;;  %v2660_v61 = vld [vmem:[#allocation7 + $0x168] sm:$0xf]  ;;  %v2692_v45 = vld [vmem:[#allocation7 + $0x110] sm:$0xf] }
 0x387   : > { %v977_v2 = vpop.f32.mrf.mxu2  ;;  %1365 = vmatpush.bf16.msrb.mxu0 %v2725_v30  ;;  %v2693_v50 = vor.u32 %v3070_v46, %v2692_v45 }
 0x388   : > { %2595 = vmatmul.msk.bf16.vlgmr.msra.gmra.mxu2 %vm912_vm6, %v958_v1  ;;  %2596 = vmatmul.msk.bf16.vlgmr.msrb.gmra.mxu3 %vm912_vm6, %v959_v63  ;;  %v3078_v63 = vld [vmem:[#allocation7 + $0x158] sm:$0xf0] }
 0x389   : > { %1351 = vmatpush.bf16.msra.mxu3 %v2721_v29  ;;  %v2657_v1 = vor.u32 %v3078_v63, %v2656_v62  ;;  %v2716_v29 = vld [vmem:[#allocation7 + $0x158] sm:$0xf] }
 0x38d   : > { %1352 = vmatpush.bf16.msra.mxu3 %v2713_v32  ;;  %v3079_v32 = vld [vmem:[#allocation7 + $0x160] sm:$0xf0] }
 0x38e   : > { %v2717_v34 = vor.u32 %v3079_v32, %v2716_v29 }
 0x38f   : > { %v979_v3 = vpop.f32.mrf.mxu2 }
 0x390   : > { %v3075_v3 = vld [vmem:[#allocation7 + $0x140] sm:$0xf0]  ;;  %1366 = vmatpush.bf16.msrb.mxu0 %v2717_v34 }
 0x391   : > { %1353 = vmatpush.bf16.msra.mxu3 %v2705_v35 }
 0x394   : > { %1367 = vmatpush.bf16.msrb.mxu0 %v2709_v40 }
 0x395   : > { %1354 = vmatpush.bf16.msra.mxu3 %v2697_v38  ;;  %v3944_v38 = vld [vmem:[#allocation5 + $0x1] ss:$2 sm:$0x7] }
 0x396   : > { %v1266_v43 = vrot.slane %v3944_v38, 1 }
 0x398   : > { %v1268_v34 = vperm.slane %v1266_v43, 1 }
 0x399   : > { %1355 = vmatpush.bf16.msra.mxu3 %v2689_v42  ;;  %v3073_v42 = vld [vmem:[#allocation7 + $0x130] sm:$0xf0] }
 0x39a   : > { %v2701_v0 = vor.u32 %v3073_v42, %v2700_v41 }
 0x39c   : > { %1368 = vmatpush.bf16.msrb.mxu0 %v2701_v0 }
 0x39d   : > { %1356 = vmatpush.bf16.msra.mxu3 %v2681_v44 }
 0x3a0   : > { %1369 = vmatpush.bf16.msrb.mxu0 %v2693_v50 }
 0x3a1   : > { %1357 = vmatpush.bf16.msra.mxu3 %v2673_v48  ;;  %v1267_v48 = vperm.slane %v1266_v43, 0 }
 0x3a5   : > { %1358 = vmatpush.bf16.msra.mxu3 %v2665_v55  ;;  %v3067_v55 = vld [vmem:[#allocation7 + $0x100] sm:$0xf0] }
 0x3a8   : > { %1359 = vmatmul.bf16.vlgmr.msra.gmra.mxu3 %v3939_v59 }
 0x403   : > { %v1034_v5 = vpop.f32.mrf.mxu0 }
 0x404   : > { %1047 = vrot.lane.b32.xlu0 %v1034_v5, %s3625_s17  ;;  %v2648_v5 = vld [vmem:[#allocation7 + $0x120] sm:$0xf] }
 0x40b   : > { %v1036_v6 = vpop.f32.mrf.mxu0  ;;  %v996_v8 = vpop.f32.mrf.mxu2 }
 0x40c   : > { %v1015_v9 = vpop.f32.mrf.mxu3  ;;  %1039 = vrot.lane.b32.xlu1 %v996_v8, %s3623_s27  ;;  %v3072_v6 = vld [vmem:[#allocation7 + $0x128] sm:$0xf0] }
 0x40d   : > { %1043 = vrot.lane.b32.xlu2 %v1015_v9, %s3624_s16  ;;  %v2649_v8 = vor.u32 %v3072_v6, %v2648_v5  ;;  %v2644_v9 = vld [vmem:[#allocation7 + $0x108] sm:$0xf]  ;;  %v1144_v5 = vperm.slane %v3871_v31, 3 }
 0x413   : > { %v998_v10 = vpop.f32.mrf.mxu2 }
 0x414   : > { %v1017_v11 = vpop.f32.mrf.mxu3  ;;  %v3069_v10 = vld [vmem:[#allocation7 + $0x110] sm:$0xf0] }
 0x415   : > { %v2645_v11 = vor.u32 %v3069_v10, %v2644_v9  ;;  %v3061_v9 = vld [vmem:[#allocation7 + $0xd0] sm:$0xf0] }
 0x42b   : > { %v1360_v51 = vpop.f32.mrf.mxu3 }
 0x42c   : > { %v1361_v57 = vadd.f32 %v1360_v51, %v1267_v48  ;;  %v1199_v51 = vld [vmem:[%s4085_s3] sm:$0xff] }
 0x433   : > { %v1362_v6 = vpop.f32.mrf.mxu3 }
 0x434   : > { %v1363_v10 = vadd.f32 %v1362_v6, %v1267_v48 }
 0x436   : > { %v1388_v13 = vpack.c.bf16 %v1363_v10, %v1363_v10 }
 0x467   : > { %v1044_v21 = vpop.permute.xlu2 %1043 }
 0x476   : > { %v1048_v22 = vpop.permute.xlu0 %1047 }
 0x47e   : > { %v1040_v20 = vpop.permute.xlu1 %1039 }
 0x47f   : > { %v1050_v12 = vsel %vm835_vm4, %v977_v2, %v1040_v20  ;;  %v2652_v2 = vld [vmem:[#allocation7 + $0x138] sm:$0xf]  ;;  %v3060_v20 = vld [vmem:[#allocation7 + $0xc8] sm:$0xf0] }
 0x480   : > { %v1052_v23 = vsel %vm1051_vm7, %v1050_v12, %v1044_v21  ;;  %v2653_v4 = vor.u32 %v3075_v3, %v2652_v2  ;;  %v2633_v21 = vor.u32 %v3060_v20, %v2632_v19 }
 0x481   : > { %v1054_v24 = vsel %vm1053_vm8, %v1052_v23, %v1048_v22 }
 0x482   : > { %v1055_v25 = vpack.c.bf16 %v1054_v24, %v1054_v24 }
 0x484   : > { %1113 = vmatmul.bf16.vlgmr.msrb.gmra.mxu1 %v1055_v25 }
 0x501   : > { %v1114_v49 = vpop.f32.mrf.mxu1 }
 0x502   : > { %v1115_v52 = vadd.f32 %v3274_v47, %v1114_v49 }
 0x504   : > { %v3932_v53 = vadd.f32 %v1115_v52, %v3876_v39  ;;  %v2661_v39 = vor.u32 %v3081_v54, %v2660_v61  ;;  %v2684_v52 = vld [vmem:[#allocation7 + $0xf8] sm:$0xf]  ;;  %v2676_v54 = vld [vmem:[#allocation7 + $0xe0] sm:$0xf] }
 0x505   : > { %v2685_v61 = vor.u32 %v3067_v55, %v2684_v52 }
 0x506   : > { %1119 = vadd.xlane.f32.xlu1 %v3932_v53  ;;  %v1122_v58 = vmul.f32 %v3932_v53, %v3932_v53  ;;  %1253 = vmatpush.bf16.msrb.mxu2 %v2661_v39  ;;  %v3064_v39 = vld [vmem:[#allocation7 + $0xe8] sm:$0xf0] }
 0x507   : > { %1370 = vmatpush.bf16.msrb.mxu0 %v2685_v61  ;;  %v2677_v3 = vor.u32 %v3064_v39, %v2676_v54 }
 0x508   : > { %1123 = vadd.xlane.f32.xlu2 %v1122_v58 }
 0x509   : > { %v1116_v60 = vpop.f32.mrf.mxu1 }
 0x50a   : > { %1254 = vmatpush.bf16.msrb.mxu2 %v2657_v1  ;;  %v1387_v60 = vpack.c.bf16 %v1361_v57, %v1361_v57  ;;  %v1142_v1 = vperm.slane %v3871_v31, 2 }
 0x50b   : > { %1371 = vmatpush.bf16.msrb.mxu0 %v2677_v3 }
 0x50c   : > { %1391 = vrot.lane.b32.xlu0 %v1387_v60, %s3625_s17 }
 0x50e   : > { %1255 = vmatpush.bf16.msrb.mxu2 %v2653_v4 }
 0x512   : > { %1256 = vmatpush.bf16.msrb.mxu2 %v2649_v8  ;;  %v2668_v8 = vld [vmem:[#allocation7 + $0xc8] sm:$0xf] }
 0x513   : > { %v2669_v14 = vor.u32 %v3061_v9, %v2668_v8 }
 0x514   : > { %1393 = vrot.lane.b32.xlu0 %v1388_v13, %s3625_s17 }
 0x515   : > { %1372 = vmatpush.bf16.msrb.mxu0 %v2669_v14 }
 0x516   : > { %1257 = vmatpush.bf16.msrb.mxu2 %v2645_v11 }
 0x518   : > { %1373 = vmatmul.bf16.vlgmr.msrb.gmra.mxu0 %v3939_v59 }
 0x51a   : > { %1258 = vmatpush.bf16.msrb.mxu2 %v2641_v15  ;;  %v1419_v15 = vunpack.c.l.b16 %v1387_v60 }
 0x51c   : > { %1395 = vrot.lane.b32.xlu0 %v1387_v60, %s3624_s16 }
 0x51e   : > { %1259 = vmatpush.bf16.msrb.mxu2 %v2637_v18 }
 0x520   : > { %1401 = vrot.lane.b32.xlu2 %v1388_v13, %s3623_s27 }
 0x522   : > { %1260 = vmatpush.bf16.msrb.mxu2 %v2633_v21  ;;  %v1203_v21 = vperm.slane %v3944_v38, 0 }
 0x524   : > { %1397 = vrot.lane.b32.xlu0 %v1388_v13, %s3624_s16 }
 0x579   : > { %v1120_v12 = vpop.xlane.xlu1 %1119 }
 0x57a   : > { %v1121_v22 = vmul.f32 %v1120_v12, %v3864_v7 }
 0x57b   : > { %v1124_v23 = vpop.xlane.xlu2 %1123 }
 0x57c   : > { %v1126_v24 = vmul.f32 %v1121_v22, %v1121_v22  ;;  %v1125_v25 = vmul.f32 %v1124_v23, %v3864_v7  ;;  %v1129_v63 = vsub.f32 %v3932_v53, %v1121_v22  ;;  %v1420_v53 = vunpack.c.l.b16 %v1388_v13 }
 0x57e   : > { %v1127_v26 = vsub.f32 %v1125_v25, %v1126_v24  ;;  %v1421_v31 = vpack.c.b16 %v1420_v53, %v1419_v15  ;;  %v1392_v19 = vpop.permute.xlu0 %1391 }
 0x57f   : > { %v1441_v20 = vunpack.c.l.b16 %v1392_v19 }
 0x580   : > { %v1128_v33 = vmax.f32 %v1127_v26, 0.0  ;;  %v1426_v18 = vsel %vm835_vm4, %v1421_v31, 0 }
 0x581   : > { %1435 = vmatpush.bf16.xpose.msra.mxu1 %v1426_v18 }
 0x582   : > { %v1130_v35 = vadd.f32 1e-12, %v1128_v33 }
 0x584   : > { %3297 = vrsqrt.f32 %v1130_v35  ;;  %vm1137_vm10 = vweird.f32 %v1130_v35 }
 0x586   : > { %v1394_v12 = vpop.permute.xlu0 %1393 }
 0x587   : > { %v1442_v22 = vunpack.c.l.b16 %v1394_v12 }
 0x589   : > { %v1443_v24 = vpack.c.b16 %v1442_v22, %v1441_v20 }
 0x58a   : > { %v3298_v44 = vpop.eup %3297 }
 0x58b   : > { %v1132_v47 = vmul.f32 %v3298_v44, %v1130_v35  ;;  %vm1138_vm9 = vweird.f32 %v3298_v44  ;;  %v1448_v26 = vsel %vm835_vm4, %v1443_v24, 0 }
 0x58c   : > { %vm1139_vm11 = vmor %vm1137_vm10, %vm1138_vm9  ;;  %1457 = vmatpush.bf16.xpose.msra.mxu2 %v1448_v26 }
 0x58d   : > { %v1133_v49 = vmul.f32 %v3298_v44, %v1132_v47  ;;  %v1402_v47 = vpop.permute.xlu2 %1401 }
 0x58e   : > { %v1396_v59 = vpop.permute.xlu0 %1395 }
 0x58f   : > { %v1134_v56 = vmul.f32 0.5, %v1133_v49  ;;  %v1463_v29 = vunpack.c.l.b16 %v1396_v59  ;;  %v1486_v49 = vunpack.c.l.b16 %v1402_v47 }
 0x591   : > { %v1135_v58 = vsub.f32 1.5, %v1134_v56 }
 0x593   : > { %v1136_v62 = vmul.f32 %v3298_v44, %v1135_v58 }
 0x595   : > { %v1140_v2 = vsel %vm1139_vm11, %v3298_v44, %v1136_v62  ;;  %v1374_v35 = vpop.f32.mrf.mxu0 }
 0x596   : > { %v1141_v4 = vmul.f32 %v1140_v2, %v1129_v63  ;;  %v1398_v30 = vpop.permute.xlu0 %1397  ;;  %v1375_v37 = vadd.f32 %v1374_v35, %v1268_v34 }
 0x597   : > { %v1464_v32 = vunpack.c.l.b16 %v1398_v30 }
 0x598   : > { %v1143_v11 = vmul.f32 %v1142_v1, %v1141_v4  ;;  %v3973_v40 = vpack.c.bf16 %v1375_v37, %v1375_v37 }
 0x599   : > { %v1465_v33 = vpack.c.b16 %v1464_v32, %v1463_v29 }
 0x59a   : > { %v3953_v16 = vadd.f32 %v1144_v5, %v1143_v11  ;;  %v1556_v0 = vunpack.c.l.b16 %v3973_v40 }
 0x59b   : > { %v1470_v36 = vsel %vm835_vm4, %v1465_v33, 0 }
 0x59c   : > { %v1200_v17 = vpack.c.bf16 %v3953_v16, %v3953_v16  ;;  %1479 = vmatpush.bf16.xpose.msrb.mxu3 %v1470_v36 }
 0x59d   : > { %v1376_v41 = vpop.f32.mrf.mxu0 }
 0x59e   : > { %1261 = vmatmul.bf16.vlgmr.msrb.gmra.mxu2 %v1200_v17  ;;  %v1377_v42 = vadd.f32 %v1376_v41, %v1268_v34 }
 0x5a0   : > { %v3978_v44 = vpack.c.bf16 %v1377_v42, %v1377_v42 }
 0x5a2   : > { %v1557_v38 = vunpack.c.l.b16 %v3978_v44 }
 0x5a4   : > { %v1558_v43 = vpack.c.b16 %v1557_v38, %v1556_v0 }
 0x5a6   : > { %1570 = vmatpush.bf16.msrb.mxu1 %v1558_v43 }
 0x621   : > { %v1262_v23 = vpop.f32.mrf.mxu2 }
 0x622   : > { %v1263_v25 = vadd.f32 %v1262_v23, %v1203_v21 }
 0x624   : > { %v1379_v27 = vpack.c.bf16 %v1263_v25, %v1263_v25 }
 0x626   : > { %1383 = vrot.lane.b32.xlu1 %v1379_v27, %s3624_s16  ;;  %1381 = vrot.lane.b32.xlu0 %v1379_v27, %s3625_s17 }
 0x627   : > { %2726 = vmatmul.msk.bf16.vlgmr.msra.gmra.mxu1 %vm835_vm4, %v1379_v27 }
 0x629   : > { %v1264_v28 = vpop.f32.mrf.mxu2 }
 0x62e   : > { %1399 = vrot.lane.b32.xlu0 %v1387_v60, %s3623_s27 }
 0x636   : > { %1385 = vrot.lane.b32.xlu0 %v1379_v27, %s3623_s27 }
 0x63e   : > { %1407 = vrot.lane.b32.xlu0 %v3973_v40, %s3625_s17 }
 0x698   : > { %v1384_v45 = vpop.permute.xlu1 %1383  ;;  %v1382_v46 = vpop.permute.xlu0 %1381 }
 0x699   : > { %2727 = vmatmul.msk.bf16.vlgmr.msra.gmra.mxu2 %vm835_vm4, %v1382_v46  ;;  %2728 = vmatmul.msk.bf16.vlgmr.msrb.gmra.mxu3 %vm835_vm4, %v1384_v45 }
 0x6a0   : > { %v1400_v48 = vpop.permute.xlu0 %1399 }
 0x6a1   : > { %v1485_v50 = vunpack.c.l.b16 %v1400_v48 }
 0x6a3   : > { %v1487_v52 = vpack.c.b16 %v1486_v49, %v1485_v50 }
 0x6a4   : > { %v1437_v55 = vpop.f32.mrf.mxu1 }
 0x6a5   : > { %v3986_v56 = vadd.f32 %v1437_v55, %v1199_v51  ;;  %v1492_v57 = vsel %vm835_vm4, %v1487_v52, 0 }
 0x6a6   : > { %1501 = vmatpush.bf16.xpose.msra.mxu0 %v1492_v57 }
 0x6a7   : > { %v1508_v58 = vsel %vm1507_vm12, %v3986_v56, -inf }
 0x6a8   : > { %1509 = vmax.xlane.f32.xlu0 %v1508_v58  ;;  %v1386_v60 = vpop.permute.xlu0 %1385 }
 0x6ac   : > { %v1439_v61 = vpop.f32.mrf.mxu1 }
 0x6ad   : > { %2729 = vmatmul.msk.bf16.vlgmr.msra.gmra.mxu0 %vm835_vm4, %v1386_v60 }
 0x6b0   : > { %v1408_v10 = vpop.permute.xlu0 %1407 }
 0x6b1   : > { %v1576_v29 = vunpack.c.l.b16 %v1408_v10 }
 0x71b   : > { %v1510_v11 = vpop.xlane.xlu0 %1509 }
 0x71c   : > { %v1459_v54 = vpop.f32.mrf.mxu2  ;;  %v1481_v39 = vpop.f32.mrf.mxu3  ;;  %v1520_v35 = vsub.f32 %v3986_v56, %v1510_v11  ;;  %v3085_v11 = vld [vmem:[#allocation8 + $0x50] sm:$0xff] }
 0x71d   : > { %v1460_v62 = vadd.f32 %v1459_v54, %v1199_v51  ;;  %v1482_v63 = vadd.f32 %v1481_v39, %v1199_v51 }
 0x71e   : > { %v1524_v36 = vmul.f32 1.442695, %v1520_v35 }
 0x71f   : > { %v1514_v1 = vsel %vm1507_vm12, %v1482_v63, -inf  ;;  %v1511_v2 = vsel %vm1507_vm12, %v1460_v62, -inf }
 0x720   : > { %1515 = vmax.xlane.f32.xlu1 %v1514_v1  ;;  %1512 = vmax.xlane.f32.xlu0 %v1511_v2 }
 0x724   : > { %v1461_v3 = vpop.f32.mrf.mxu2  ;;  %v1483_v4 = vpop.f32.mrf.mxu3 }
 0x725   : > { %v3090_v4 = vld [vmem:[#allocation8 + $0x78] sm:$0xff] }
 0x726   : > { %1701 = vmatpush.bf16.msra.mxu1 %v3090_v4  ;;  %v2834_v4 = vld [vmem:[#allocation10 + $0x90] sm:$0xf0] }
 0x72a   : > { %v1503_v5 = vpop.f32.mrf.mxu0 }
 0x72b   : > { %v1504_v6 = vadd.f32 %v1503_v5, %v1199_v51  ;;  %v3089_v5 = vld [vmem:[#allocation8 + $0x70] sm:$0xff] }
 0x72c   : > { %1702 = vmatpush.bf16.msra.mxu1 %v3089_v5  ;;  %v2840_v5 = vld [vmem:[#allocation10 + $0x88] sm:$0xf] }
 0x72d   : > { %v1517_v8 = vsel %vm1507_vm12, %v1504_v6, -inf }
 0x72e   : > { %1518 = vmax.xlane.f32.xlu2 %v1517_v8  ;;  %v3087_v8 = vld [vmem:[#allocation8 + $0x60] sm:$0xff] }
 0x732   : > { %v1505_v9 = vpop.f32.mrf.mxu0 }
 0x733   : > { %v3086_v9 = vld [vmem:[#allocation8 + $0x58] sm:$0xff] }
 0x734   : > { %1413 = vrot.lane.b32.xlu0 %v3978_v44, %s3624_s16 }
 0x739   : > { %1409 = vrot.lane.b32.xlu1 %v3978_v44, %s3625_s17 }
 0x746   : > { %1411 = vrot.lane.b32.xlu2 %v3973_v40, %s3624_s16 }
 0x793   : > { %v1516_v13 = vpop.xlane.xlu1 %1515  ;;  %v1513_v14 = vpop.xlane.xlu0 %1512 }
 0x794   : > { %v1522_v15 = vsub.f32 %v1482_v63, %v1516_v13  ;;  %v1521_v53 = vsub.f32 %v1460_v62, %v1513_v14  ;;  %v3084_v13 = vld [vmem:[#allocation8 + $0x48] sm:$0xff] }
 0x796   : > { %v1528_v17 = vmul.f32 1.442695, %v1522_v15  ;;  %v1526_v31 = vmul.f32 1.442695, %v1521_v53  ;;  %v3083_v15 = vld [vmem:[#allocation8 + $0x40] sm:$0xff] }
 0x798   : > { %3299 = vpow2.f32 %v1528_v17 }
 0x799   : > { %3301 = vpow2.f32 %v1526_v31 }
 0x79e   : > { %v3300_v18 = vpop.eup %3299 }
 0x79f   : > { %v3302_v19 = vpop.eup %3301  ;;  %v1538_v20 = vsel %vm1507_vm12, %v3300_v18, 0.0 }
 0x7a0   : > { %1539 = vadd.xlane.f32.xlu2 %v1538_v20  ;;  %v1535_v21 = vsel %vm1507_vm12, %v3302_v19, 0.0 }
 0x7a1   : > { %1536 = vadd.xlane.f32.xlu1 %v1535_v21  ;;  %v1519_v12 = vpop.xlane.xlu2 %1518 }
 0x7a2   : > { %v1523_v22 = vsub.f32 %v1504_v6, %v1519_v12  ;;  %v3088_v6 = vld [vmem:[#allocation8 + $0x68] sm:$0xff]  ;;  %v3275_v12 = vld [vmem:[%s4088_s6 + $0x1] ss:$0 sm:$0xff] }
 0x7a3   : > { %1703 = vmatpush.bf16.msra.mxu1 %v3088_v6  ;;  %v3110_v6 = vld [vmem:[#allocation10 + $0x94] sm:$0xf0] }
 0x7a4   : > { %v1530_v23 = vmul.f32 1.442695, %v1523_v22 }
 0x7a6   : > { %3303 = vpow2.f32 %v1530_v23  ;;  %v1414_v24 = vpop.permute.xlu0 %1413 }
 0x7a7   : > { %v1597_v26 = vunpack.c.l.b16 %v1414_v24  ;;  %3305 = vpow2.f32 %v1524_v36  ;;  %1704 = vmatpush.bf16.msra.mxu1 %v3087_v8  ;;  %v3120_v36 = vld [vmem:[#allocation10 + $0xec] sm:$0xf] }
 0x7a9   : > { %v1412_v25 = vpop.permute.xlu2 %1411 }
 0x7aa   : > { %v1596_v27 = vunpack.c.l.b16 %v1412_v25 }
 0x7ab   : > { %v1410_v59 = vpop.permute.xlu1 %1409  ;;  %1705 = vmatpush.bf16.msra.mxu1 %v3086_v9  ;;  %v2841_v9 = vor.u32 %v3110_v6, %v2840_v5  ;;  %v3154_v5 = vld [vmem:[#allocation13 + $0xf8] sm:$0xff] }
 0x7ac   : > { %v3304_v28 = vpop.eup %3303  ;;  %v1598_v30 = vpack.c.b16 %v1597_v26, %v1596_v27  ;;  %v1577_v32 = vunpack.c.l.b16 %v1410_v59  ;;  %v2880_v27 = vld [vmem:[#allocation10 + $0xe0] sm:$0xf]  ;;  %v3121_v59 = vld [vmem:[#allocation10 + $0xec] sm:$0xf0] }
 0x7ad   : > { %v1541_v33 = vsel %vm1507_vm12, %v3304_v28, 0.0  ;;  %v3306_v37 = vpop.eup %3305 }
 0x7ae   : > { %v1578_v34 = vpack.c.b16 %v1577_v32, %v1576_v29  ;;  %1542 = vadd.xlane.f32.xlu0 %v1541_v33  ;;  %1610 = vmatpush.bf16.msra.mxu3 %v1598_v30  ;;  %v1532_v41 = vsel %vm1507_vm12, %v3306_v37, 0.0  ;;  %v2881_v29 = vor.u32 %v3121_v59, %v2880_v27  ;;  %v2882_v30 = vld [vmem:[#allocation10 + $0xf0] sm:$0xf0]  ;;  %v2888_v32 = vld [vmem:[#allocation10 + $0xe8] sm:$0xf] }
 0x7af   : > { %1706 = vmatpush.bf16.msra.mxu1 %v3085_v11  ;;  %v3122_v33 = vld [vmem:[#allocation10 + $0xf4] sm:$0xf0]  ;;  %v2842_v11 = vld [vmem:[#allocation10 + $0x98] sm:$0xf0]  ;;  %v3099_v27 = vld [vmem:[#allocation10 + $0x44] sm:$0xf] }
 0x7b0   : > { %1590 = vmatpush.bf16.msrb.mxu2 %v1578_v34  ;;  %v2889_v35 = vor.u32 %v3122_v33, %v2888_v32 }
 0x7b3   : > { %1707 = vmatpush.bf16.msra.mxu1 %v3084_v13 }
 0x7b4   : > { %1945 = vmatpush.bf16.msra.mxu2 %v2881_v29  ;;  %v2808_v29 = vld [vmem:[#allocation10 + $0x48] sm:$0xf] }
 0x7b7   : > { %1708 = vmatpush.bf16.msra.mxu1 %v3083_v15  ;;  %v3105_v15 = vld [vmem:[#allocation10 + $0x6c] sm:$0xf0] }
 0x7b8   : > { %1417 = vrot.lane.b32.xlu2 %v3978_v44, %s3623_s27 }
 0x7ba   : > { %1415 = vrot.lane.b32.xlu1 %v3973_v40, %s3623_s27 }
 0x7e4   : > { %1533 = vadd.xlane.f32.xlu1 %v1532_v41  ;;  %v2864_v41 = vld [vmem:[#allocation10 + $0xc0] sm:$0xf] }
 0x813   : > { %v1540_v42 = vpop.xlane.xlu2 %1539 }
 0x814   : > { %3307 = vrcp.f32 %v1540_v42  ;;  %v1537_v0 = vpop.xlane.xlu1 %1536  ;;  %v3117_v42 = vld [vmem:[#allocation10 + $0xcc] sm:$0xf0] }
 0x815   : > { %3309 = vrcp.f32 %v1537_v0  ;;  %v3115_v0 = vld [vmem:[#allocation10 + $0xc4] sm:$0xf] }
 0x81a   : > { %v3308_v38 = vpop.eup %3307 }
 0x81b   : > { %v3310_v43 = vpop.eup %3309  ;;  %v1550_v45 = vmul.f32 %v3308_v38, %v3300_v18  ;;  %v1418_v48 = vpop.permute.xlu2 %1417  ;;  %v2865_v38 = vor.u32 %v3117_v42, %v2864_v41  ;;  %v3095_v41 = vld [vmem:[#allocation10 + $0x24] sm:$0xf] }
 0x81c   : > { %v1549_v46 = vmul.f32 %v3310_v43, %v3302_v19  ;;  %v1617_v51 = vunpack.c.l.b16 %v1418_v48  ;;  %v2866_v43 = vld [vmem:[#allocation10 + $0xd0] sm:$0xf0]  ;;  %v2874_v48 = vld [vmem:[#allocation10 + $0xd8] sm:$0xf0] }
 0x81d   : > { %v1554_v44 = vpack.c.bf16 %v1550_v45, %v1550_v45  ;;  %v2872_v45 = vld [vmem:[#allocation10 + $0xc8] sm:$0xf]  ;;  %1946 = vmatpush.bf16.msra.mxu2 %v2865_v38 }
 0x81e   : > { %v1553_v47 = vpack.c.bf16 %v1549_v46, %v1549_v46  ;;  %v3118_v46 = vld [vmem:[#allocation10 + $0xd4] sm:$0xf0]  ;;  %v2792_v38 = vld [vmem:[#allocation10 + $0x28] sm:$0xf] }
 0x81f   : > { %2732 = vmatmul.msk.bf16.vlgmr.msra.gmra.mxu3 %vm1507_vm12, %v1554_v44  ;;  %v2869_v44 = vor.u32 %v3115_v0, %v2866_v43  ;;  %v2786_v0 = vld [vmem:[#allocation10 + $0x30] sm:$0xf0]  ;;  %v3098_v43 = vld [vmem:[#allocation10 + $0x34] sm:$0xf0] }
 0x820   : > { %2731 = vmatmul.msk.bf16.vlgmr.msrb.gmra.mxu2 %vm1507_vm12, %v1553_v47  ;;  %v2873_v47 = vor.u32 %v3118_v46, %v2872_v45  ;;  %v2789_v45 = vor.u32 %v3095_v41, %v2786_v0  ;;  %v2793_v46 = vor.u32 %v3098_v43, %v2792_v38  ;;  %v3148_v43 = vld [vmem:[#allocation13 + $0xc8] sm:$0xff] }
 0x821   : > { %v1543_v40 = vpop.xlane.xlu0 %1542 }
 0x822   : > { %3311 = vrcp.f32 %v1543_v40  ;;  %v3116_v40 = vld [vmem:[#allocation10 + $0xcc] sm:$0xf] }
 0x828   : > { %v3312_v49 = vpop.eup %3311 }
 0x829   : > { %v1551_v55 = vmul.f32 %v3312_v49, %v3304_v28  ;;  %v3119_v28 = vld [vmem:[#allocation10 + $0xe4] sm:$0xf]  ;;  %v2877_v49 = vor.u32 %v3116_v40, %v2874_v48  ;;  %v2768_v40 = vld [vmem:[#allocation10] sm:$0xf] }
 0x82a   : > { %v2885_v34 = vor.u32 %v3119_v28, %v2882_v30  ;;  %v2802_v28 = vld [vmem:[#allocation10 + $0x50] sm:$0xf0]  ;;  %v3102_v30 = vld [vmem:[#allocation10 + $0x54] sm:$0xf0] }
 0x82b   : > { %v1555_v57 = vpack.c.bf16 %v1551_v55, %v1551_v55  ;;  %v2805_v32 = vor.u32 %v3099_v27, %v2802_v28  ;;  %v2809_v33 = vor.u32 %v3102_v30, %v2808_v29  ;;  %v3126_v27 = vld [vmem:[#allocation13 + $0x18] sm:$0xff]  ;;  %v3141_v30 = vld [vmem:[#allocation13 + $0x90] sm:$0xff] }
 0x82c   : > { %v1416_v50 = vpop.permute.xlu1 %1415  ;;  %1958 = vmatpush.bf16.msrb.mxu3 %v2885_v34  ;;  %v3100_v34 = vld [vmem:[#allocation10 + $0x4c] sm:$0xf] }
 0x82d   : > { %v1616_v52 = vunpack.c.l.b16 %v1416_v50  ;;  %v2848_v50 = vld [vmem:[#allocation10 + $0xa0] sm:$0xf] }
 0x82f   : > { %v1618_v56 = vpack.c.b16 %v1617_v51, %v1616_v52  ;;  %v3113_v51 = vld [vmem:[#allocation10 + $0xac] sm:$0xf0]  ;;  %v3111_v52 = vld [vmem:[#allocation10 + $0xa4] sm:$0xf] }
 0x830   : > { %1959 = vmatpush.bf16.msrb.mxu3 %v2869_v44  ;;  %v2849_v55 = vor.u32 %v3113_v51, %v2848_v50  ;;  %v3096_v44 = vld [vmem:[#allocation10 + $0x2c] sm:$0xf]  ;;  %v3091_v50 = vld [vmem:[#allocation10 + $0x4] sm:$0xf]  ;;  %v2770_v51 = vld [vmem:[#allocation10 + $0x10] sm:$0xf0] }
 0x831   : > { %1630 = vmatpush.bf16.msrb.mxu0 %v1618_v56  ;;  %v2850_v56 = vld [vmem:[#allocation10 + $0xb0] sm:$0xf0] }
 0x832   : > { %1947 = vmatpush.bf16.msra.mxu2 %v2849_v55  ;;  %v2773_v55 = vor.u32 %v3091_v50, %v2770_v51  ;;  %v3131_v50 = vld [vmem:[#allocation13 + $0x40] sm:$0xff]  ;;  %v1775_v51 = vld [vmem:[#allocation11] sm:$0xf] }
 0x834   : > { %2733 = vmatmul.msk.bf16.vlgmr.msrb.gmra.mxu0 %vm1507_vm12, %v1555_v57  ;;  %v2856_v57 = vld [vmem:[#allocation10 + $0xa8] sm:$0xf] }
 0x835   : > { %1971 = vmatpush.bf16.msra.mxu0 %v2889_v35  ;;  %v2810_v35 = vld [vmem:[#allocation10 + $0x58] sm:$0xf0] }
 0x839   : > { %1972 = vmatpush.bf16.msra.mxu0 %v2873_v47  ;;  %v2794_v47 = vld [vmem:[#allocation10 + $0x38] sm:$0xf0] }
 0x83a   : > { %v2797_v48 = vor.u32 %v3096_v44, %v2794_v47  ;;  %v3139_v44 = vld [vmem:[#allocation13 + $0x80] sm:$0xff] }
 0x83b   : > { %v3147_v47 = vld [vmem:[#allocation13 + $0xc0] sm:$0xff] }
 0x857   : > { %v1534_v58 = vpop.xlane.xlu1 %1533 }
 0x858   : > { %3313 = vrcp.f32 %v1534_v58  ;;  %v3114_v58 = vld [vmem:[#allocation10 + $0xb4] sm:$0xf0] }
 0x85e   : > { %v3314_v60 = vpop.eup %3313 }
 0x85f   : > { %v1548_v61 = vmul.f32 %v3314_v60, %v3306_v37  ;;  %v2890_v37 = vld [vmem:[#allocation10 + $0xf8] sm:$0xf0]  ;;  %v2853_v60 = vor.u32 %v3111_v52, %v2850_v56  ;;  %v2776_v56 = vld [vmem:[#allocation10 + $0x8] sm:$0xf] }
 0x861   : > { %v1552_v54 = vpack.c.bf16 %v1548_v61, %v1548_v61  ;;  %v2857_v61 = vor.u32 %v3114_v58, %v2856_v57  ;;  %1960 = vmatpush.bf16.msrb.mxu3 %v2853_v60  ;;  %v3094_v57 = vld [vmem:[#allocation10 + $0x14] sm:$0xf0]  ;;  %v3092_v58 = vld [vmem:[#allocation10 + $0xc] sm:$0xf] }
 0x863   : > { %2730 = vmatmul.msk.bf16.vlgmr.msrb.gmra.mxu1 %vm1507_vm12, %v1552_v54  ;;  %v3112_v54 = vld [vmem:[#allocation10 + $0xac] sm:$0xf]  ;;  %1973 = vmatpush.bf16.msra.mxu0 %v2857_v61  ;;  %v2777_v61 = vor.u32 %v3094_v57, %v2776_v56 }
 0x867   : > { %1974 = vmatpush.bf16.msra.mxu0 %v2841_v9  ;;  %v3138_v9 = vld [vmem:[#allocation13 + $0x78] sm:$0xff] }
 0x8a2   : > { %v1612_v39 = vpop.f32.mrf.mxu3 }
 0x8a3   : > { %v1592_v62 = vpop.f32.mrf.mxu2 }
 0x8a4   : > { %1637 = vrot.lane.b32.xlu2 %v1592_v62, %s3623_s27  ;;  %s2492_s27 = sshll.u32 %s3825_s5, 3 }
 0x8a5   : > { %s541_s10 = scalar_lea.vmem [#allocation14], %s2492_s27 }
 0x8a6   : > { %s2330_s11 = sshll.u32 %s541_s10, 4  ;;  %s2331_s11 = int_to_ptr.vmem [resolvable:$true] %s2330_s11 }
 0x8aa   : > { %v1614_v63 = vpop.f32.mrf.mxu3 }
 0x8ab   : > { %v1594_v1 = vpop.f32.mrf.mxu2  ;;  %v2832_v63 = vld [vmem:[#allocation10 + $0x80] sm:$0xf] }
 0x8ac   : > { %1641 = vrot.lane.b32.xlu2 %v1612_v39, %s3624_s16  ;;  %v2858_v39 = vld [vmem:[#allocation10 + $0xb8] sm:$0xf0]  ;;  %v3109_v1 = vld [vmem:[#allocation10 + $0x8c] sm:$0xf0]  ;;  %s3023_s16 = sshll.u32 %s3715_s28, 3  ;;  %s2318_s28 = scalar_lea.sflag [#allocation4], %s3825_s5 }
 0x8ad   : > { %v2861_v62 = vor.u32 %v3112_v54, %v2858_v39  ;;  %v2778_v54 = vld [vmem:[#allocation10 + $0x18] sm:$0xf0]  ;;  %s2328_s13 = scalar_lea.hbm %s4116_s19, %s3023_s16 }
 0x8ae   : > { %s2332_s7 = sshll.u32 %s2328_s13, 4  ;;  %s2333_s7 = int_to_ptr.hbm [resolvable:$true] %s2332_s7 }
 0x8af   : > { %s3542_s9 = sshra.s32 %s2333_s7, 4  ;;  %s3543_s9 = int_to_ptr.hbm [resolvable:$true] %s3542_s9 }
 0x8b0   : > { %s3544_s29 = scalar_lea.hbm %s3543_s9, 8  ;;  %p3549_p7 = scmp.lt.s32.totalorder %s3543_s9, %s4116_s19 }
 0x8b1   : > { %v1632_v2 = vpop.f32.mrf.mxu0  ;;  %p3545_p1 = scmp.ne.s32.totalorder %s3543_s9, %s3544_s29  ;;  %p3550_p8 = scmp.lt.s32.totalorder %s3548_s26, %s3544_s29 }
 0x8b3   : > { %p3546_p4 = pnand %p3545_p1, %p3794_p5  ;;  %p3551_p9 = por %p3550_p8, %p3549_p7 }
 0x8b4   : > { %1645 = vrot.lane.b32.xlu2 %v1632_v2, %s3625_s17  ;;  %v3107_v2 = vld [vmem:[#allocation10 + $0x84] sm:$0xf] }
 0x8b5   : > { %v2837_v8 = vor.u32 %v3107_v2, %v2834_v4  ;;  %v3146_v4 = vld [vmem:[#allocation13 + $0xb8] sm:$0xff]  ;;  %p3547_p12 = pneg %p3546_p4 }
 0x8b7   : > { %1961 = vmatpush.bf16.msrb.mxu3 %v2837_v8  ;;  %v3130_v8 = vld [vmem:[#allocation13 + $0x38] sm:$0xff]  ;;  %p3552_p10 = pnand %p3551_p9, %p3547_p12 }
 0x8b9   : > { %v1634_v3 = vpop.f32.mrf.mxu0 }
 0x8ba   : > { %v2833_v3 = vor.u32 %v3109_v1, %v2832_v63 }
 0x8bc   : > { %1948 = vmatpush.bf16.msra.mxu2 %v2833_v3 }
 0x8e0   : > { %v1572_v10 = vpop.f32.mrf.mxu1 }
 0x8e8   : > { %v1574_v14 = vpop.f32.mrf.mxu1 }
 0x8e9   : > { %v2816_v14 = vld [vmem:[#allocation10 + $0x60] sm:$0xf] }
 0x8fe   : > { %v1638_v53 = vpop.permute.xlu2 %1637 }
 0x8ff   : > { %v1648_v31 = vsel %vm835_vm4, %v1572_v10, %v1638_v53  ;;  %v3108_v10 = vld [vmem:[#allocation10 + $0x8c] sm:$0xf]  ;;  %v3103_v53 = vld [vmem:[#allocation10 + $0x64] sm:$0xf] }
 0x900   : > { %v2845_v13 = vor.u32 %v3108_v10, %v2842_v11  ;;  %v3145_v10 = vld [vmem:[#allocation13 + $0xb0] sm:$0xff] }
 0x901   : > { %v3153_v11 = vld [vmem:[#allocation13 + $0xf0] sm:$0xff] }
 0x906   : > { %v1642_v17 = vpop.permute.xlu2 %1641 }
 0x907   : > { %v1649_v18 = vsel %vm1051_vm7, %v1648_v31, %v1642_v17  ;;  %v2817_v17 = vor.u32 %v3105_v15, %v2816_v14  ;;  %v2818_v31 = vld [vmem:[#allocation10 + $0x70] sm:$0xf0] }
 0x908   : > { %v3129_v14 = vld [vmem:[#allocation13 + $0x30] sm:$0xff] }
 0x909   : > { %1949 = vmatpush.bf16.msra.mxu2 %v2817_v17  ;;  %v3137_v15 = vld [vmem:[#allocation13 + $0x70] sm:$0xff]  ;;  %v3128_v17 = vld [vmem:[#allocation13 + $0x28] sm:$0xff] }
 0x90e   : > { %v1646_v19 = vpop.permute.xlu2 %1645 }
 0x90f   : > { %v1650_v20 = vsel %vm1053_vm8, %v1649_v18, %v1646_v19  ;;  %v2824_v18 = vld [vmem:[#allocation10 + $0x68] sm:$0xf]  ;;  %v3106_v19 = vld [vmem:[#allocation10 + $0x74] sm:$0xf0] }
 0x910   : > { %v1651_v21 = vpack.c.bf16 %v1650_v20, %v1650_v20  ;;  %v2821_v20 = vor.u32 %v3103_v53, %v2818_v31  ;;  %v3152_v53 = vld [vmem:[#allocation13 + $0xe8] sm:$0xff] }
 0x911   : > { %v3136_v31 = vld [vmem:[#allocation13 + $0x68] sm:$0xff] }
 0x912   : > { %1709 = vmatmul.bf16.vlgmr.msra.gmra.mxu1 %v1651_v21  ;;  %v2825_v21 = vor.u32 %v3106_v19, %v2824_v18  ;;  %1962 = vmatpush.bf16.msrb.mxu3 %v2821_v20  ;;  %v3143_v18 = vld [vmem:[#allocation13 + $0xa0] sm:$0xff] }
 0x913   : > { %v3151_v19 = vld [vmem:[#allocation13 + $0xe0] sm:$0xff] }
 0x914   : > { %1975 = vmatpush.bf16.msra.mxu0 %v2825_v21  ;;  %v3127_v21 = vld [vmem:[#allocation13 + $0x20] sm:$0xff] }
 0x916   : > { %1963 = vmatpush.bf16.msrb.mxu3 %v2805_v32  ;;  %v3149_v32 = vld [vmem:[#allocation13 + $0xd0] sm:$0xff] }
 0x918   : > { %1976 = vmatpush.bf16.msra.mxu0 %v2809_v33 }
 0x91a   : > { %1964 = vmatpush.bf16.msrb.mxu3 %v2789_v45  ;;  %v3125_v45 = vld [vmem:[#allocation13 + $0x10] sm:$0xff] }
 0x91c   : > { %1977 = vmatpush.bf16.msra.mxu0 %v2793_v46  ;;  %v3133_v46 = vld [vmem:[#allocation13 + $0x50] sm:$0xff] }
 0x91e   : > { %1965 = vmatpush.bf16.msrb.mxu3 %v2773_v55  ;;  %v1780_v55 = vperm.slane %v1775_v51, 3 }
 0x920   : > { %1978 = vmatpush.bf16.msra.mxu0 %v2777_v61  ;;  %v1777_v61 = vperm.slane %v1775_v51, 0 }
 0x922   : > { %2276 = vmatpush.bf16.msra.mxu3 %v3138_v9 }
 0x924   : > { %2289 = vmatpush.bf16.msrb.mxu0 %v3146_v4 }
 0x926   : > { %2277 = vmatpush.bf16.msra.mxu3 %v3137_v15 }
 0x928   : > { %2290 = vmatpush.bf16.msrb.mxu0 %v3145_v10 }
 0x92a   : > { %2278 = vmatpush.bf16.msra.mxu3 %v3136_v31 }
 0x98f   : > { %v1710_v22 = vpop.f32.mrf.mxu1 }
 0x990   : > { %v1711_v23 = vadd.f32 %v3275_v12, %v1710_v22  ;;  %v3104_v12 = vld [vmem:[#allocation10 + $0x6c] sm:$0xf]  ;;  %v2826_v22 = vld [vmem:[#allocation10 + $0x78] sm:$0xf0] }
 0x992   : > { %v4024_v24 = vadd.f32 %v1711_v23, %v3953_v16  ;;  %v2893_v16 = vor.u32 %v3120_v36, %v2890_v37  ;;  %v2829_v23 = vor.u32 %v3104_v12, %v2826_v22  ;;  %v2813_v36 = vor.u32 %v3100_v34, %v2810_v35  ;;  %v2784_v37 = vld [vmem:[#allocation10 + $0x20] sm:$0xf]  ;;  %v3135_v12 = vld [vmem:[#allocation13 + $0x60] sm:$0xff]  ;;  %v3317_v35 = vld [vmem:[%s4086_s4] sm:$0x3f] }
 0x993   : > { %2279 = vmatpush.bf16.msra.mxu3 %v3135_v12  ;;  %v1740_v41 = vperm.slane %v3317_v35, 5 }
 0x994   : > { %1715 = vadd.xlane.f32.xlu2 %v4024_v24  ;;  %v1718_v25 = vmul.f32 %v4024_v24, %v4024_v24  ;;  %1984 = vmatpush.bf16.msrb.mxu1 %v2893_v16  ;;  %v3097_v16 = vld [vmem:[#allocation10 + $0x2c] sm:$0xf0] }
 0x995   : > { %v2785_v42 = vor.u32 %v3097_v16, %v2784_v37 }
 0x996   : > { %1719 = vadd.xlane.f32.xlu0 %v1718_v25  ;;  %v2800_v25 = vld [vmem:[#allocation10 + $0x40] sm:$0xf] }
 0x997   : > { %v1712_v26 = vpop.f32.mrf.mxu1 }
 0x998   : > { %1985 = vmatpush.bf16.msrb.mxu1 %v2877_v49  ;;  %v3101_v26 = vld [vmem:[#allocation10 + $0x4c] sm:$0xf0] }
 0x999   : > { %v2801_v59 = vor.u32 %v3101_v26, %v2800_v25  ;;  %v3093_v49 = vld [vmem:[#allocation10 + $0xc] sm:$0xf0]  ;;  %v3142_v25 = vld [vmem:[#allocation13 + $0x98] sm:$0xff] }
 0x99a   : > { %v2769_v52 = vor.u32 %v3093_v49, %v2768_v40  ;;  %v3150_v26 = vld [vmem:[#allocation13 + $0xd8] sm:$0xff]  ;;  %v3124_v40 = vld [vmem:[#allocation13 + $0x8] sm:$0xff]  ;;  %v3123_v49 = vld [vmem:[#allocation13] sm:$0xff] }
 0x99b   : > { %1950 = vmatpush.bf16.msra.mxu2 %v2801_v59  ;;  %v3134_v59 = vld [vmem:[#allocation13 + $0x58] sm:$0xff] }
 0x99c   : > { %1986 = vmatpush.bf16.msrb.mxu1 %v2861_v62  ;;  %v2781_v62 = vor.u32 %v3092_v58, %v2778_v54  ;;  %2280 = vmatpush.bf16.msra.mxu3 %v3134_v59  ;;  %v1778_v54 = vperm.slane %v1775_v51, 1 }
 0x99f   : > { %1951 = vmatpush.bf16.msra.mxu2 %v2785_v42 }
 0x9a0   : > { %1987 = vmatpush.bf16.msrb.mxu1 %v2845_v13  ;;  %2281 = vmatpush.bf16.msra.mxu3 %v3133_v46 }
 0x9a3   : > { %1952 = vmatpush.bf16.msra.mxu2 %v2769_v52  ;;  %v1779_v52 = vperm.slane %v1775_v51, 2 }
 0x9a4   : > { %1988 = vmatpush.bf16.msrb.mxu1 %v2829_v23 }
 0x9a7   : > { %2263 = vmatpush.bf16.msrb.mxu2 %v3130_v8 }
 0x9a8   : > { %1989 = vmatpush.bf16.msrb.mxu1 %v2813_v36  ;;  %v1738_v36 = vperm.slane %v3317_v35, 4 }
 0x9ab   : > { %2264 = vmatpush.bf16.msrb.mxu2 %v3129_v14 }
 0x9ac   : > { %1990 = vmatpush.bf16.msrb.mxu1 %v2797_v48  ;;  %v3132_v48 = vld [vmem:[#allocation13 + $0x48] sm:$0xff] }
 0x9ad   : > { %2282 = vmatpush.bf16.msra.mxu3 %v3132_v48 }
 0x9af   : > { %2265 = vmatpush.bf16.msrb.mxu2 %v3128_v17 }
 0x9b0   : > { %1991 = vmatpush.bf16.msrb.mxu1 %v2781_v62 }
 0x9b1   : > { %2283 = vmatpush.bf16.msra.mxu3 %v3131_v50 }
 0x9b3   : > { %2266 = vmatpush.bf16.msrb.mxu2 %v3127_v21 }
 0x9b4   : > { %2302 = vmatpush.bf16.msra.mxu1 %v3154_v5 }
 0x9b7   : > { %2267 = vmatpush.bf16.msrb.mxu2 %v3126_v27 }
 0x9b8   : > { %2303 = vmatpush.bf16.msra.mxu1 %v3153_v11 }
 0x9bb   : > { %2268 = vmatpush.bf16.msrb.mxu2 %v3125_v45 }
 0x9bc   : > { %2304 = vmatpush.bf16.msra.mxu1 %v3152_v53 }
 0x9bf   : > { %2269 = vmatpush.bf16.msrb.mxu2 %v3124_v40 }
 0x9c0   : > { %2305 = vmatpush.bf16.msra.mxu1 %v3151_v19 }
 0x9c3   : > { %2270 = vmatpush.bf16.msrb.mxu2 %v3123_v49 }
 0x9c4   : > { %2306 = vmatpush.bf16.msra.mxu1 %v3150_v26 }
 0x9c8   : > { %2307 = vmatpush.bf16.msra.mxu1 %v3149_v32 }
 0x9cc   : > { %2308 = vmatpush.bf16.msra.mxu1 %v3148_v43 }
 0x9d0   : > { %2309 = vmatpush.bf16.msra.mxu1 %v3147_v47 }
 0xa07   : > { %v1716_v60 = vpop.xlane.xlu2 %1715 }
 0xa08   : > { %v4030_v39 = vmul.f32 %v1716_v60, %v3864_v7 }
 0xa09   : > { %v1720_v63 = vpop.xlane.xlu0 %1719 }
 0xa0a   : > { %v1722_v1 = vmul.f32 %v4030_v39, %v4030_v39  ;;  %v1721_v2 = vmul.f32 %v1720_v63, %v3864_v7  ;;  %v3144_v7 = vld [vmem:[#allocation13 + $0xa8] sm:$0xff]  ;;  %v1725_v34 = vsub.f32 %v4024_v24, %v4030_v39 }
 0xa0b   : > { %2291 = vmatpush.bf16.msrb.mxu0 %v3144_v7  ;;  %v3140_v24 = vld [vmem:[#allocation13 + $0x88] sm:$0xff] }
 0xa0c   : > { %v1723_v3 = vsub.f32 %v1721_v2, %v1722_v1 }
 0xa0e   : > { %v1724_v6 = vmax.f32 %v1723_v3, 0.0 }
 0xa0f   : > { %2292 = vmatpush.bf16.msrb.mxu0 %v3143_v18  ;;  %v3276_v18 = vld [vmem:[%s4088_s6 + $0x2] ss:$0 sm:$0xff] }
 0xa10   : > { %v1726_v13 = vadd.f32 1e-12, %v1724_v6 }
 0xa12   : > { %3315 = vrsqrt.f32 %v1726_v13  ;;  %vm1733_vm14 = vweird.f32 %v1726_v13 }
 0xa13   : > { %2293 = vmatpush.bf16.msrb.mxu0 %v3142_v25 }
 0xa17   : > { %2294 = vmatpush.bf16.msrb.mxu0 %v3141_v30 }
 0xa18   : > { %v3316_v20 = vpop.eup %3315 }
 0xa19   : > { %v1728_v22 = vmul.f32 %v3316_v20, %v1726_v13  ;;  %vm1734_vm13 = vweird.f32 %v3316_v20 }
 0xa1a   : > { %vm1735_vm15 = vmor %vm1733_vm14, %vm1734_vm13 }
 0xa1b   : > { %v1729_v23 = vmul.f32 %v3316_v20, %v1728_v22  ;;  %2295 = vmatpush.bf16.msrb.mxu0 %v3140_v24 }
 0xa1d   : > { %v1730_v28 = vmul.f32 0.5, %v1729_v23 }
 0xa1f   : > { %v1731_v29 = vsub.f32 1.5, %v1730_v28  ;;  %2296 = vmatpush.bf16.msrb.mxu0 %v3139_v44 }
 0xa21   : > { %v1732_v33 = vmul.f32 %v3316_v20, %v1731_v29 }
 0xa23   : > { %v1736_v37 = vsel %vm1735_vm15, %v3316_v20, %v1732_v33 }
 0xa24   : > { %v1737_v16 = vmul.f32 %v1736_v37, %v1725_v34 }
 0xa26   : > { %v1739_v42 = vmul.f32 %v1738_v36, %v1737_v16 }
 0xa28   : > { %v4040_v0 = vadd.f32 %v1740_v41, %v1739_v42 }
 0xa2a   : > { %v1742_v38 = vpack.c.bf16 %v4040_v0, %v4040_v0 }
 0xa2c   : > { %1953 = vmatmul.bf16.vlgmr.msra.gmra.mxu2 %v1742_v38  ;;  %1966 = vmatmul.bf16.vlgmr.msrb.gmra.mxu3 %v1742_v38 }
 0xa2d   : > { %1979 = vmatmul.bf16.vlgmr.msra.gmra.mxu0 %v1742_v38  ;;  %1992 = vmatmul.bf16.vlgmr.msrb.gmra.mxu1 %v1742_v38 }
 0xaaa   : > { %v1980_v56 = vpop.f32.mrf.mxu0  ;;  %v1993_v57 = vpop.f32.mrf.mxu1 }
 0xaab   : > { %v1981_v58 = vadd.f32 %v1980_v56, %v1779_v52  ;;  %v1994_v60 = vadd.f32 %v1993_v57, %v1780_v55 }
 0xaad   : > { %v1999_v39 = vmax.f32 %v1981_v58, 0.0  ;;  %v2000_v62 = vmax.f32 %v1994_v60, 0.0 }
 0xaaf   : > { %v2003_v63 = vpack.c.bf16 %v1999_v39, %v1999_v39  ;;  %v2004_v1 = vpack.c.bf16 %v2000_v62, %v2000_v62  ;;  %v1954_v2 = vpop.f32.mrf.mxu2  ;;  %v1967_v3 = vpop.f32.mrf.mxu3 }
 0xab0   : > { %v1955_v4 = vadd.f32 %v1954_v2, %v1777_v61  ;;  %v1968_v5 = vadd.f32 %v1967_v3, %v1778_v54 }
 0xab1   : > { %2297 = vmatmul.bf16.vlgmr.msrb.gmra.mxu0 %v2003_v63  ;;  %2310 = vmatmul.bf16.vlgmr.msra.gmra.mxu1 %v2004_v1 }
 0xab2   : > { %v1997_v6 = vmax.f32 %v1955_v4, 0.0  ;;  %v1998_v8 = vmax.f32 %v1968_v5, 0.0  ;;  %v1982_v9 = vpop.f32.mrf.mxu0  ;;  %v1995_v10 = vpop.f32.mrf.mxu1 }
 0xab4   : > { %v2001_v11 = vpack.c.bf16 %v1997_v6, %v1997_v6  ;;  %v2002_v13 = vpack.c.bf16 %v1998_v8, %v1998_v8 }
 0xab6   : > { %2271 = vmatmul.bf16.vlgmr.msrb.gmra.mxu2 %v2001_v11  ;;  %2284 = vmatmul.bf16.vlgmr.msra.gmra.mxu3 %v2002_v13 }
 0xab7   : > { %v1956_v14 = vpop.f32.mrf.mxu2  ;;  %v1969_v15 = vpop.f32.mrf.mxu3 }
 0xb2e   : > { %v2298_v7 = vpop.f32.mrf.mxu0  ;;  %v2311_v53 = vpop.f32.mrf.mxu1 }
 0xb36   : > { %v2300_v17 = vpop.f32.mrf.mxu0  ;;  %v2313_v31 = vpop.f32.mrf.mxu1 }
 0xb39   : > { %v2272_v19 = vpop.f32.mrf.mxu2  ;;  %v2285_v20 = vpop.f32.mrf.mxu3 }
 0xb3a   : > { %v2273_v21 = vadd.f32 %v3276_v18, %v2272_v19 }
 0xb3c   : > { %v2286_v12 = vadd.f32 %v2285_v20, %v2273_v21 }
 0xb3e   : > { %v2299_v22 = vadd.f32 %v2298_v7, %v2286_v12 }
 0xb40   : > { %v2312_v23 = vadd.f32 %v2311_v53, %v2299_v22 }
 0xb41   : > { %v2274_v25 = vpop.f32.mrf.mxu2  ;;  %v2287_v26 = vpop.f32.mrf.mxu3 }
 0xb42   : > { %v2315_v27 = vadd.f32 %v2312_v23, %v4040_v0 }
 0xb44   : > { %2316 = vst [vmem:[%s541_s10] sm:$0xff] %v2315_v27 }
 0xb45   : > { %3555 = shalt.err (!%p3552_p10)
}
 0xb46   : > { %3181 = dma.vmem_to_hbm [thread:$0]  (%p3794_p5), %s2331_s11, 128, %s2333_s7, %s2318_s28  }
 0xb47 PF: > { %s2344_s5 = sand.u32 1, %s3594_s21   ;;  %p4117_p13 = scmp.ge.s32.totalorder %s3606_s24, 2 }
 0xb48   : > { %s2345_s16 = scalar_lea.sflag [#allocation4], %s2344_s5 }
 0xb49   : > { %p3207_p11 = pnand %p4117_p13, %p3798_p6 }
 0xb4b   : > { %p3208_p0 = pneg %p3207_p11 }
 0xb4d   : > { %3589 = dma.done.wait (%p3208_p0), %s2345_s16, 128  }
 0xb4e   : > { %3591 = vsyncadd (%p3208_p0), %s2345_s16, 4294967168  ;;  %p28_p2 = scmp.ge.s32.totalorder %s3768_s30, 4   ;;  %s4118_s21 = smov %s3598_s22 }
 0xb4f   : > { %s4119_s22 = smov %s3602_s23  ;;  %s4120_s23 = smov %s3779_s8 }
 0xb50   : > { %s4121_s24 = smov %s3768_s30  ;;  %30 = sbr.rel (!%p28_p2) target bundleno = 16 (0x10), region = 143 }
 0xb55   :  { %2351 = vsyncpa [#allocation3], 1 }
 0xb56   :  { %2353 = vsyncpa [#allocation3 + $0x1], 1 }
 0xb57   :  { %2354 = vsyncpa [#allocation6], 1 }
 0xb58   :  { %2355 = vsyncpa [#allocation9], 1 }
 0xb59   :  { %2356 = vsyncpa [#allocation12], 1 }
 0xb5a   :  { %2357 = vsyncpa [#allocation4], 1 }
 0xb5b   :  { %2359 = vsyncpa [#allocation4 + $0x1], 1 }

</bundles_post_ra>
